<compile_context>
chip_gen: v6e
topology: v6e:2x2x1
jax: 0.10.0
libtpu: 0.0.40
codegen_flags: <defaults>
</compile_context>

<pallas_src>
import functools

import jax
import jax.numpy as jnp
import numpy as np
from jax.experimental import pallas as pl
from jax.experimental.pallas import tpu as pltpu


# ----------------------------------------------------------------------------
# Fused forward kernel: one grid step = one batch element.
# ----------------------------------------------------------------------------
def _fused_attn_kernel(x_ref, w_qkv_ref, w_out_ref, *rest,
                       heads, dim_head, qk_norm, use_rotary, scale):
    # Optional inputs (only present when the corresponding feature is on).
    i = 0
    if qk_norm:
        gq_ref, gk_ref = rest[i], rest[i + 1]
        i += 2
    if use_rotary:
        cos_ref, sin_ref, rot_ref = rest[i], rest[i + 1], rest[i + 2]
        i += 3
    o_ref = rest[i]

    HD = heads * dim_head
    x = x_ref[0].astype(jnp.float32)                      # (N, dim)

    # to_qkv: x @ W_qkv^T, weight kept as (3*HD, dim) -> contract over dim.
    qkv = jax.lax.dot_general(
        x, w_qkv_ref[...], (((1,), (1,)), ((), ())),
        preferred_element_type=jnp.float32)               # (N, 3*HD)

    if use_rotary:
        cos = cos_ref[...]                                # (N, D)
        sin = sin_ref[...]                                # (N, D)
        rot = rot_ref[...]                                # (D, D) constant +-1

    outs = []
    for h in range(heads):                                # static unroll, H small
        lo = h * dim_head
        q = qkv[:, lo:lo + dim_head]                      # (N, D)
        k = qkv[:, HD + lo:HD + lo + dim_head]            # (N, D)
        v = qkv[:, 2 * HD + lo:2 * HD + lo + dim_head]    # (N, D)

        if qk_norm:
            # F.normalize(x, -1) * gamma * sqrt(D); sqrt(D) (and the attention
            # scale, for q) are pre-folded into gq/gk in the wrapper.
            # rsqrt(max(sumsq, eps^2)) == 1 / max(||x||, eps)  (eps = 1e-12).
            q = q * jax.lax.rsqrt(
                jnp.maximum(jnp.sum(q * q, axis=-1, keepdims=True), 1e-24))
            q = q * gq_ref[h:h + 1, :]
            k = k * jax.lax.rsqrt(
                jnp.maximum(jnp.sum(k * k, axis=-1, keepdims=True), 1e-24))
            k = k * gk_ref[h:h + 1, :]
        else:
            q = q * scale                                 # fold scale into q

        if use_rotary:
            # rotate_half(t) == t @ rot  (constant permutation/sign matrix);
            # runs on the otherwise-idle MXU instead of slices + concat.
            q = q * cos + jnp.dot(q, rot,
                                  preferred_element_type=jnp.float32) * sin
            k = k * cos + jnp.dot(k, rot,
                                  preferred_element_type=jnp.float32) * sin

        # scores = q @ k^T  (scale already folded into q / gamma_q)
        s = jax.lax.dot_general(
            q, k, (((1,), (1,)), ((), ())),
            preferred_element_type=jnp.float32)           # (N, N)

        # numerically-stable softmax; normalize AFTER attn@v so the
        # reciprocal multiply touches (N, D) elements, not (N, N).
        m = jnp.max(s, axis=-1, keepdims=True)
        p = jnp.exp(s - m)
        o_h = jnp.dot(p, v, preferred_element_type=jnp.float32)   # (N, D)
        o_h = o_h * pl.reciprocal(jnp.sum(p, axis=-1, keepdims=True),
                                  approx=True)
        outs.append(o_h)

    # 'b h n d -> b n (h d)' then to_out: o @ W_out^T (contract over HD).
    o = jnp.concatenate(outs, axis=-1)                    # (N, HD)
    y = jax.lax.dot_general(
        o, w_out_ref[...], (((1,), (1,)), ((), ())),
        preferred_element_type=jnp.float32)               # (N, dim)
    o_ref[0] = y.astype(o_ref.dtype)


# ----------------------------------------------------------------------------
# Full Attention.forward
# ----------------------------------------------------------------------------
def attention_forward(x, w_qkv, w_out, gamma_q, gamma_k, rotary_emb, *,
                      heads, dim_head, qk_norm, qk_norm_scale):
    B, N, dim = x.shape
    HD = heads * dim_head
    use_rotary = rotary_emb is not None
    scale = float(qk_norm_scale) if qk_norm else dim_head ** -0.5

    inputs = [x, w_qkv, w_out]
    in_specs = [
        pl.BlockSpec((1, N, dim), lambda b: (b, 0, 0)),
        pl.BlockSpec((3 * HD, dim), lambda b: (0, 0)),
        pl.BlockSpec((dim, HD), lambda b: (0, 0)),
    ]

    if qk_norm:
        # Fold dim_head**0.5 (and the attention scale, for q) into gamma.
        gq = gamma_q.reshape(heads, dim_head) * (dim_head ** 0.5) * scale
        gk = gamma_k.reshape(heads, dim_head) * (dim_head ** 0.5)
        g_spec = pl.BlockSpec((heads, dim_head), lambda b: (0, 0))
        inputs += [gq.astype(jnp.float32), gk.astype(jnp.float32)]
        in_specs += [g_spec, g_spec]

    if use_rotary:
        cos = jnp.cos(rotary_emb).astype(jnp.float32)     # (N, D)
        sin = jnp.sin(rotary_emb).astype(jnp.float32)     # (N, D)
        d2 = dim_head // 2
        # Constant matrix s.t.  t @ rot == rotate_half(t) == cat(-t2, t1).
        rot = np.zeros((dim_head, dim_head), np.float32)
        rot[np.arange(d2) + d2, np.arange(d2)] = -1.0
        rot[np.arange(d2), np.arange(d2) + d2] = 1.0
        cs_spec = pl.BlockSpec((N, dim_head), lambda b: (0, 0))
        inputs += [cos, sin, jnp.asarray(rot)]
        in_specs += [cs_spec, cs_spec,
                     pl.BlockSpec((dim_head, dim_head), lambda b: (0, 0))]

    kernel = functools.partial(
        _fused_attn_kernel, heads=heads, dim_head=dim_head,
        qk_norm=qk_norm, use_rotary=use_rotary, scale=scale)

    return pl.pallas_call(
        kernel,
        out_shape=jax.ShapeDtypeStruct((B, N, dim), x.dtype),
        grid=(B,),
        in_specs=in_specs,
        out_specs=pl.BlockSpec((1, N, dim), lambda b: (b, 0, 0)),
        compiler_params=pltpu.CompilerParams(
            dimension_semantics=("parallel",)),
    )(*inputs)


# ----------------------------------------------------------------------------
# Pure-JAX reference (mirrors the PyTorch module exactly) for validation.
# ----------------------------------------------------------------------------
def reference_forward(x, w_qkv, w_out, gamma_q, gamma_k, rotary_emb, *,
                      heads, dim_head, qk_norm, qk_norm_scale):
    B, N, dim = x.shape
    qkv = x @ w_qkv.T
    q, k, v = jnp.split(qkv, 3, axis=-1)
    to_heads = lambda t: t.reshape(B, N, heads, dim_head).transpose(0, 2, 1, 3)
    q, k, v = map(to_heads, (q, k, v))
    if qk_norm:
        def mrms(t, g):
            nrm = jnp.sqrt(jnp.sum(t * t, -1, keepdims=True))
            return t / jnp.maximum(nrm, 1e-12) * g * (dim_head ** 0.5)
        q, k = mrms(q, gamma_q), mrms(k, gamma_k)
    if rotary_emb is not None:
        cos, sin = jnp.cos(rotary_emb), jnp.sin(rotary_emb)
        def rot(t):
            t1, t2 = jnp.split(t, 2, axis=-1)
            return t * cos + jnp.concatenate([-t2, t1], -1) * sin
        q, k = rot(q), rot(k)
    scale = float(qk_norm_scale) if qk_norm else dim_head ** -0.5
    s = jnp.einsum("bhid,bhjd->bhij", q, k) * scale
    attn = jax.nn.softmax(s, axis=-1)
    out = jnp.einsum("bhij,bhjd->bhid", attn, v)
    out = out.transpose(0, 2, 1, 3).reshape(B, N, heads * dim_head)
    return out @ w_out.T


if __name__ == "__main__":
    # Small shapes consistent with the module.
    B, N, dim = 2, 16, 32
    heads, dim_head = 4, 16
    dim_inner = heads * dim_head
    qk_norm = True
    qk_norm_scale = 10.0

    key = jax.random.PRNGKey(0)
    k1, k2, k3, k4, k5 = jax.random.split(key, 5)

    x = jax.random.normal(k1, (B, N, dim), jnp.float32)
    # PyTorch Linear weights are (out_features, in_features).
    w_qkv = 0.05 * jax.random.normal(k2, (dim_inner * 3, dim), jnp.float32)
    w_out = 0.05 * jax.random.normal(k3, (dim, dim_inner), jnp.float32)
    # MultiheadRMSNorm gamma init is ones; add a small deterministic
    # perturbation so the norm path is exercised non-trivially.
    gamma_q = (jnp.ones((heads, 1, dim_head), jnp.float32)
               + 0.1 * jax.random.normal(k4, (heads, 1, dim_head), jnp.float32))
    gamma_k = (jnp.ones((heads, 1, dim_head), jnp.float32)
               + 0.1 * jax.random.normal(k5, (heads, 1, dim_head), jnp.float32))

    # Rotary embedding: (N, dim_head), standard RoPE frequencies.
    pos = jnp.arange(N, dtype=jnp.float32)
    inv_freq = 1.0 / (10000.0 ** (jnp.arange(0, dim_head, 2, dtype=jnp.float32)
                                  / dim_head))
    freqs = pos[:, None] * inv_freq[None, :]
    rotary_emb = jnp.concatenate([freqs, freqs], axis=-1)  # (N, dim_head)

    out = attention_forward(
        x, w_qkv, w_out, gamma_q, gamma_k, rotary_emb,
        heads=heads, dim_head=dim_head, qk_norm=qk_norm,
        qk_norm_scale=qk_norm_scale)
    out = jax.block_until_ready(out)

    ref = reference_forward(
        x, w_qkv, w_out, gamma_q, gamma_k, rotary_emb,
        heads=heads, dim_head=dim_head, qk_norm=qk_norm,
        qk_norm_scale=qk_norm_scale)

    assert out.shape == (B, N, dim)
    # Tolerance accounts for the EUP approximate reciprocal used in the
    # softmax normalization (relative error ~1e-3 on the denominator).
    np.testing.assert_allclose(np.asarray(out), np.asarray(ref),
                               atol=3e-3, rtol=3e-3)
    print("KERNEL_OK")
</pallas_src>

<mosaic_0001>
module attributes {stable_mosaic.version = 11 : i64} {
  func.func @_fused_attn_kernel(%arg0: i32, %arg1: memref<1x16x32xf32, #tpu.memory_space<vmem>>, %arg2: memref<192x32xf32, #tpu.memory_space<vmem>>, %arg3: memref<32x64xf32, #tpu.memory_space<vmem>>, %arg4: memref<4x16xf32, #tpu.memory_space<vmem>>, %arg5: memref<4x16xf32, #tpu.memory_space<vmem>>, %arg6: memref<16x16xf32, #tpu.memory_space<vmem>>, %arg7: memref<16x16xf32, #tpu.memory_space<vmem>>, %arg8: memref<16x16xf32, #tpu.memory_space<vmem>>, %arg9: memref<1x16x32xf32, #tpu.memory_space<vmem>>) attributes {dimension_semantics = [#tpu.dimension_semantics<parallel>], iteration_bounds = array<i64: 2>, scalar_prefetch = 0 : i64, scratch_operands = 0 : i64, tpu.core_type = #tpu.core_type<tc>, window_params = [{transform_indices = @transform_0, window_bounds = array<i64: 1, 16, 32>}, {pipeline_mode = #tpu.pipeline_mode<synchronous>, transform_indices = @transform_1, window_bounds = array<i64: 192, 32>}, {pipeline_mode = #tpu.pipeline_mode<synchronous>, transform_indices = @transform_2, window_bounds = array<i64: 32, 64>}, {pipeline_mode = #tpu.pipeline_mode<synchronous>, transform_indices = @transform_3, window_bounds = array<i64: 4, 16>}, {pipeline_mode = #tpu.pipeline_mode<synchronous>, transform_indices = @transform_4, window_bounds = array<i64: 4, 16>}, {pipeline_mode = #tpu.pipeline_mode<synchronous>, transform_indices = @transform_5, window_bounds = array<i64: 16, 16>}, {pipeline_mode = #tpu.pipeline_mode<synchronous>, transform_indices = @transform_6, window_bounds = array<i64: 16, 16>}, {pipeline_mode = #tpu.pipeline_mode<synchronous>, transform_indices = @transform_7, window_bounds = array<i64: 16, 16>}, {transform_indices = @transform_8, window_bounds = array<i64: 1, 16, 32>}]} {
    %c0 = arith.constant 0 : index
    %c0_0 = arith.constant 0 : index
    %c0_1 = arith.constant 0 : index
    %0 = vector.load %arg1[%c0, %c0_0, %c0_1] : memref<1x16x32xf32, #tpu.memory_space<vmem>>, vector<1x16x32xf32>
    %1 = vector.shape_cast %0 : vector<1x16x32xf32> to vector<16x32xf32>
    %c0_2 = arith.constant 0 : index
    %c0_3 = arith.constant 0 : index
    %2 = vector.load %arg2[%c0_2, %c0_3] : memref<192x32xf32, #tpu.memory_space<vmem>>, vector<192x32xf32>
    %cst = arith.constant dense<0.000000e+00> : vector<16x192xf32>
    %3 = tpu.matmul %1, %2, %cst {dimension_numbers = #tpu.dot_dimension_numbers<[1], [1], [0], [0], [0, 0, 1, 0], [], []>} : vector<16x32xf32>, vector<192x32xf32>, vector<16x192xf32> -> vector<16x192xf32>
    %c0_4 = arith.constant 0 : index
    %c0_5 = arith.constant 0 : index
    %4 = vector.load %arg6[%c0_4, %c0_5] : memref<16x16xf32, #tpu.memory_space<vmem>>, vector<16x16xf32>
    %c0_6 = arith.constant 0 : index
    %c0_7 = arith.constant 0 : index
    %5 = vector.load %arg7[%c0_6, %c0_7] : memref<16x16xf32, #tpu.memory_space<vmem>>, vector<16x16xf32>
    %c0_8 = arith.constant 0 : index
    %c0_9 = arith.constant 0 : index
    %6 = vector.load %arg8[%c0_8, %c0_9] : memref<16x16xf32, #tpu.memory_space<vmem>>, vector<16x16xf32>
    %7 = vector.extract_strided_slice %3 {offsets = [0, 0], sizes = [16, 16], strides = [1, 1]} : vector<16x192xf32> to vector<16x16xf32>
    %8 = vector.extract_strided_slice %3 {offsets = [0, 64], sizes = [16, 16], strides = [1, 1]} : vector<16x192xf32> to vector<16x16xf32>
    %9 = vector.extract_strided_slice %3 {offsets = [0, 128], sizes = [16, 16], strides = [1, 1]} : vector<16x192xf32> to vector<16x16xf32>
    %10 = arith.mulf %7, %7 : vector<16x16xf32>
    %cst_10 = arith.constant dense<0.000000e+00> : vector<16xf32>
    %11 = vector.multi_reduction <add>, %10, %cst_10 [1] : vector<16x16xf32> to vector<16xf32>
    %12 = vector.shape_cast %11 : vector<16xf32> to vector<16x1xf32>
    %cst_11 = arith.constant 1.000000e-24 : f32
    %13 = vector.broadcast %cst_11 : f32 to vector<16x1xf32>
    %14 = arith.maximumf %12, %13 : vector<16x1xf32>
    %15 = math.rsqrt %14 : vector<16x1xf32>
    %16 = vector.broadcast %15 : vector<16x1xf32> to vector<16x16xf32>
    %17 = arith.mulf %7, %16 : vector<16x16xf32>
    %c0_12 = arith.constant 0 : index
    %c0_13 = arith.constant 0 : index
    %18 = vector.load %arg4[%c0_12, %c0_13] : memref<4x16xf32, #tpu.memory_space<vmem>>, vector<1x16xf32>
    %19 = vector.broadcast %18 : vector<1x16xf32> to vector<16x16xf32>
    %20 = arith.mulf %17, %19 : vector<16x16xf32>
    %21 = arith.mulf %8, %8 : vector<16x16xf32>
    %cst_14 = arith.constant dense<0.000000e+00> : vector<16xf32>
    %22 = vector.multi_reduction <add>, %21, %cst_14 [1] : vector<16x16xf32> to vector<16xf32>
    %23 = vector.shape_cast %22 : vector<16xf32> to vector<16x1xf32>
    %cst_15 = arith.constant 1.000000e-24 : f32
    %24 = vector.broadcast %cst_15 : f32 to vector<16x1xf32>
    %25 = arith.maximumf %23, %24 : vector<16x1xf32>
    %26 = math.rsqrt %25 : vector<16x1xf32>
    %27 = vector.broadcast %26 : vector<16x1xf32> to vector<16x16xf32>
    %28 = arith.mulf %8, %27 : vector<16x16xf32>
    %c0_16 = arith.constant 0 : index
    %c0_17 = arith.constant 0 : index
    %29 = vector.load %arg5[%c0_16, %c0_17] : memref<4x16xf32, #tpu.memory_space<vmem>>, vector<1x16xf32>
    %30 = vector.broadcast %29 : vector<1x16xf32> to vector<16x16xf32>
    %31 = arith.mulf %28, %30 : vector<16x16xf32>
    %32 = arith.mulf %20, %4 : vector<16x16xf32>
    %cst_18 = arith.constant dense<0.000000e+00> : vector<16x16xf32>
    %33 = tpu.matmul %20, %6, %cst_18 {dimension_numbers = #tpu.dot_dimension_numbers<[1], [0], [0], [1], [0, 0, 1, 1], [], []>} : vector<16x16xf32>, vector<16x16xf32>, vector<16x16xf32> -> vector<16x16xf32>
    %34 = arith.mulf %33, %5 : vector<16x16xf32>
    %35 = arith.addf %32, %34 : vector<16x16xf32>
    %36 = arith.mulf %31, %4 : vector<16x16xf32>
    %cst_19 = arith.constant dense<0.000000e+00> : vector<16x16xf32>
    %37 = tpu.matmul %31, %6, %cst_19 {dimension_numbers = #tpu.dot_dimension_numbers<[1], [0], [0], [1], [0, 0, 1, 1], [], []>} : vector<16x16xf32>, vector<16x16xf32>, vector<16x16xf32> -> vector<16x16xf32>
    %38 = arith.mulf %37, %5 : vector<16x16xf32>
    %39 = arith.addf %36, %38 : vector<16x16xf32>
    %cst_20 = arith.constant dense<0.000000e+00> : vector<16x16xf32>
    %40 = tpu.matmul %35, %39, %cst_20 {dimension_numbers = #tpu.dot_dimension_numbers<[1], [1], [0], [0], [0, 0, 1, 0], [], []>} : vector<16x16xf32>, vector<16x16xf32>, vector<16x16xf32> -> vector<16x16xf32>
    %cst_21 = arith.constant dense<0xFF800000> : vector<16xf32>
    %41 = vector.multi_reduction <maximumf>, %40, %cst_21 [1] : vector<16x16xf32> to vector<16xf32>
    %42 = vector.shape_cast %41 : vector<16xf32> to vector<16x1xf32>
    %43 = vector.broadcast %42 : vector<16x1xf32> to vector<16x16xf32>
    %44 = arith.subf %40, %43 : vector<16x16xf32>
    %45 = math.exp %44 : vector<16x16xf32>
    %cst_22 = arith.constant dense<0.000000e+00> : vector<16x16xf32>
    %46 = tpu.matmul %45, %9, %cst_22 {dimension_numbers = #tpu.dot_dimension_numbers<[1], [0], [0], [1], [0, 0, 1, 1], [], []>} : vector<16x16xf32>, vector<16x16xf32>, vector<16x16xf32> -> vector<16x16xf32>
    %cst_23 = arith.constant dense<0.000000e+00> : vector<16xf32>
    %47 = vector.multi_reduction <add>, %45, %cst_23 [1] : vector<16x16xf32> to vector<16xf32>
    %48 = vector.shape_cast %47 : vector<16xf32> to vector<16x1xf32>
    %49 = tpu.reciprocal %48 {approx = true} : vector<16x1xf32> -> vector<16x1xf32>
    %50 = vector.broadcast %49 : vector<16x1xf32> to vector<16x16xf32>
    %51 = arith.mulf %46, %50 : vector<16x16xf32>
    %52 = vector.extract_strided_slice %3 {offsets = [0, 16], sizes = [16, 16], strides = [1, 1]} : vector<16x192xf32> to vector<16x16xf32>
    %53 = vector.extract_strided_slice %3 {offsets = [0, 80], sizes = [16, 16], strides = [1, 1]} : vector<16x192xf32> to vector<16x16xf32>
    %54 = vector.extract_strided_slice %3 {offsets = [0, 144], sizes = [16, 16], strides = [1, 1]} : vector<16x192xf32> to vector<16x16xf32>
    %55 = arith.mulf %52, %52 : vector<16x16xf32>
    %cst_24 = arith.constant dense<0.000000e+00> : vector<16xf32>
    %56 = vector.multi_reduction <add>, %55, %cst_24 [1] : vector<16x16xf32> to vector<16xf32>
    %57 = vector.shape_cast %56 : vector<16xf32> to vector<16x1xf32>
    %cst_25 = arith.constant 1.000000e-24 : f32
    %58 = vector.broadcast %cst_25 : f32 to vector<16x1xf32>
    %59 = arith.maximumf %57, %58 : vector<16x1xf32>
    %60 = math.rsqrt %59 : vector<16x1xf32>
    %61 = vector.broadcast %60 : vector<16x1xf32> to vector<16x16xf32>
    %62 = arith.mulf %52, %61 : vector<16x16xf32>
    %c1 = arith.constant 1 : index
    %c0_26 = arith.constant 0 : index
    %63 = vector.load %arg4[%c1, %c0_26] : memref<4x16xf32, #tpu.memory_space<vmem>>, vector<1x16xf32>
    %64 = vector.broadcast %63 : vector<1x16xf32> to vector<16x16xf32>
    %65 = arith.mulf %62, %64 : vector<16x16xf32>
    %66 = arith.mulf %53, %53 : vector<16x16xf32>
    %cst_27 = arith.constant dense<0.000000e+00> : vector<16xf32>
    %67 = vector.multi_reduction <add>, %66, %cst_27 [1] : vector<16x16xf32> to vector<16xf32>
    %68 = vector.shape_cast %67 : vector<16xf32> to vector<16x1xf32>
    %cst_28 = arith.constant 1.000000e-24 : f32
    %69 = vector.broadcast %cst_28 : f32 to vector<16x1xf32>
    %70 = arith.maximumf %68, %69 : vector<16x1xf32>
    %71 = math.rsqrt %70 : vector<16x1xf32>
    %72 = vector.broadcast %71 : vector<16x1xf32> to vector<16x16xf32>
    %73 = arith.mulf %53, %72 : vector<16x16xf32>
    %c1_29 = arith.constant 1 : index
    %c0_30 = arith.constant 0 : index
    %74 = vector.load %arg5[%c1_29, %c0_30] : memref<4x16xf32, #tpu.memory_space<vmem>>, vector<1x16xf32>
    %75 = vector.broadcast %74 : vector<1x16xf32> to vector<16x16xf32>
    %76 = arith.mulf %73, %75 : vector<16x16xf32>
    %77 = arith.mulf %65, %4 : vector<16x16xf32>
    %cst_31 = arith.constant dense<0.000000e+00> : vector<16x16xf32>
    %78 = tpu.matmul %65, %6, %cst_31 {dimension_numbers = #tpu.dot_dimension_numbers<[1], [0], [0], [1], [0, 0, 1, 1], [], []>} : vector<16x16xf32>, vector<16x16xf32>, vector<16x16xf32> -> vector<16x16xf32>
    %79 = arith.mulf %78, %5 : vector<16x16xf32>
    %80 = arith.addf %77, %79 : vector<16x16xf32>
    %81 = arith.mulf %76, %4 : vector<16x16xf32>
    %cst_32 = arith.constant dense<0.000000e+00> : vector<16x16xf32>
    %82 = tpu.matmul %76, %6, %cst_32 {dimension_numbers = #tpu.dot_dimension_numbers<[1], [0], [0], [1], [0, 0, 1, 1], [], []>} : vector<16x16xf32>, vector<16x16xf32>, vector<16x16xf32> -> vector<16x16xf32>
    %83 = arith.mulf %82, %5 : vector<16x16xf32>
    %84 = arith.addf %81, %83 : vector<16x16xf32>
    %cst_33 = arith.constant dense<0.000000e+00> : vector<16x16xf32>
    %85 = tpu.matmul %80, %84, %cst_33 {dimension_numbers = #tpu.dot_dimension_numbers<[1], [1], [0], [0], [0, 0, 1, 0], [], []>} : vector<16x16xf32>, vector<16x16xf32>, vector<16x16xf32> -> vector<16x16xf32>
    %cst_34 = arith.constant dense<0xFF800000> : vector<16xf32>
    %86 = vector.multi_reduction <maximumf>, %85, %cst_34 [1] : vector<16x16xf32> to vector<16xf32>
    %87 = vector.shape_cast %86 : vector<16xf32> to vector<16x1xf32>
    %88 = vector.broadcast %87 : vector<16x1xf32> to vector<16x16xf32>
    %89 = arith.subf %85, %88 : vector<16x16xf32>
    %90 = math.exp %89 : vector<16x16xf32>
    %cst_35 = arith.constant dense<0.000000e+00> : vector<16x16xf32>
    %91 = tpu.matmul %90, %54, %cst_35 {dimension_numbers = #tpu.dot_dimension_numbers<[1], [0], [0], [1], [0, 0, 1, 1], [], []>} : vector<16x16xf32>, vector<16x16xf32>, vector<16x16xf32> -> vector<16x16xf32>
    %cst_36 = arith.constant dense<0.000000e+00> : vector<16xf32>
    %92 = vector.multi_reduction <add>, %90, %cst_36 [1] : vector<16x16xf32> to vector<16xf32>
    %93 = vector.shape_cast %92 : vector<16xf32> to vector<16x1xf32>
    %94 = tpu.reciprocal %93 {approx = true} : vector<16x1xf32> -> vector<16x1xf32>
    %95 = vector.broadcast %94 : vector<16x1xf32> to vector<16x16xf32>
    %96 = arith.mulf %91, %95 : vector<16x16xf32>
    %97 = vector.extract_strided_slice %3 {offsets = [0, 32], sizes = [16, 16], strides = [1, 1]} : vector<16x192xf32> to vector<16x16xf32>
    %98 = vector.extract_strided_slice %3 {offsets = [0, 96], sizes = [16, 16], strides = [1, 1]} : vector<16x192xf32> to vector<16x16xf32>
    %99 = vector.extract_strided_slice %3 {offsets = [0, 160], sizes = [16, 16], strides = [1, 1]} : vector<16x192xf32> to vector<16x16xf32>
    %100 = arith.mulf %97, %97 : vector<16x16xf32>
    %cst_37 = arith.constant dense<0.000000e+00> : vector<16xf32>
    %101 = vector.multi_reduction <add>, %100, %cst_37 [1] : vector<16x16xf32> to vector<16xf32>
    %102 = vector.shape_cast %101 : vector<16xf32> to vector<16x1xf32>
    %cst_38 = arith.constant 1.000000e-24 : f32
    %103 = vector.broadcast %cst_38 : f32 to vector<16x1xf32>
    %104 = arith.maximumf %102, %103 : vector<16x1xf32>
    %105 = math.rsqrt %104 : vector<16x1xf32>
    %106 = vector.broadcast %105 : vector<16x1xf32> to vector<16x16xf32>
    %107 = arith.mulf %97, %106 : vector<16x16xf32>
    %c2 = arith.constant 2 : index
    %c0_39 = arith.constant 0 : index
    %108 = vector.load %arg4[%c2, %c0_39] : memref<4x16xf32, #tpu.memory_space<vmem>>, vector<1x16xf32>
    %109 = vector.broadcast %108 : vector<1x16xf32> to vector<16x16xf32>
    %110 = arith.mulf %107, %109 : vector<16x16xf32>
    %111 = arith.mulf %98, %98 : vector<16x16xf32>
    %cst_40 = arith.constant dense<0.000000e+00> : vector<16xf32>
    %112 = vector.multi_reduction <add>, %111, %cst_40 [1] : vector<16x16xf32> to vector<16xf32>
    %113 = vector.shape_cast %112 : vector<16xf32> to vector<16x1xf32>
    %cst_41 = arith.constant 1.000000e-24 : f32
    %114 = vector.broadcast %cst_41 : f32 to vector<16x1xf32>
    %115 = arith.maximumf %113, %114 : vector<16x1xf32>
    %116 = math.rsqrt %115 : vector<16x1xf32>
    %117 = vector.broadcast %116 : vector<16x1xf32> to vector<16x16xf32>
    %118 = arith.mulf %98, %117 : vector<16x16xf32>
    %c2_42 = arith.constant 2 : index
    %c0_43 = arith.constant 0 : index
    %119 = vector.load %arg5[%c2_42, %c0_43] : memref<4x16xf32, #tpu.memory_space<vmem>>, vector<1x16xf32>
    %120 = vector.broadcast %119 : vector<1x16xf32> to vector<16x16xf32>
    %121 = arith.mulf %118, %120 : vector<16x16xf32>
    %122 = arith.mulf %110, %4 : vector<16x16xf32>
    %cst_44 = arith.constant dense<0.000000e+00> : vector<16x16xf32>
    %123 = tpu.matmul %110, %6, %cst_44 {dimension_numbers = #tpu.dot_dimension_numbers<[1], [0], [0], [1], [0, 0, 1, 1], [], []>} : vector<16x16xf32>, vector<16x16xf32>, vector<16x16xf32> -> vector<16x16xf32>
    %124 = arith.mulf %123, %5 : vector<16x16xf32>
    %125 = arith.addf %122, %124 : vector<16x16xf32>
    %126 = arith.mulf %121, %4 : vector<16x16xf32>
    %cst_45 = arith.constant dense<0.000000e+00> : vector<16x16xf32>
    %127 = tpu.matmul %121, %6, %cst_45 {dimension_numbers = #tpu.dot_dimension_numbers<[1], [0], [0], [1], [0, 0, 1, 1], [], []>} : vector<16x16xf32>, vector<16x16xf32>, vector<16x16xf32> -> vector<16x16xf32>
    %128 = arith.mulf %127, %5 : vector<16x16xf32>
    %129 = arith.addf %126, %128 : vector<16x16xf32>
    %cst_46 = arith.constant dense<0.000000e+00> : vector<16x16xf32>
    %130 = tpu.matmul %125, %129, %cst_46 {dimension_numbers = #tpu.dot_dimension_numbers<[1], [1], [0], [0], [0, 0, 1, 0], [], []>} : vector<16x16xf32>, vector<16x16xf32>, vector<16x16xf32> -> vector<16x16xf32>
    %cst_47 = arith.constant dense<0xFF800000> : vector<16xf32>
    %131 = vector.multi_reduction <maximumf>, %130, %cst_47 [1] : vector<16x16xf32> to vector<16xf32>
    %132 = vector.shape_cast %131 : vector<16xf32> to vector<16x1xf32>
    %133 = vector.broadcast %132 : vector<16x1xf32> to vector<16x16xf32>
    %134 = arith.subf %130, %133 : vector<16x16xf32>
    %135 = math.exp %134 : vector<16x16xf32>
    %cst_48 = arith.constant dense<0.000000e+00> : vector<16x16xf32>
    %136 = tpu.matmul %135, %99, %cst_48 {dimension_numbers = #tpu.dot_dimension_numbers<[1], [0], [0], [1], [0, 0, 1, 1], [], []>} : vector<16x16xf32>, vector<16x16xf32>, vector<16x16xf32> -> vector<16x16xf32>
    %cst_49 = arith.constant dense<0.000000e+00> : vector<16xf32>
    %137 = vector.multi_reduction <add>, %135, %cst_49 [1] : vector<16x16xf32> to vector<16xf32>
    %138 = vector.shape_cast %137 : vector<16xf32> to vector<16x1xf32>
    %139 = tpu.reciprocal %138 {approx = true} : vector<16x1xf32> -> vector<16x1xf32>
    %140 = vector.broadcast %139 : vector<16x1xf32> to vector<16x16xf32>
    %141 = arith.mulf %136, %140 : vector<16x16xf32>
    %142 = vector.extract_strided_slice %3 {offsets = [0, 48], sizes = [16, 16], strides = [1, 1]} : vector<16x192xf32> to vector<16x16xf32>
    %143 = vector.extract_strided_slice %3 {offsets = [0, 112], sizes = [16, 16], strides = [1, 1]} : vector<16x192xf32> to vector<16x16xf32>
    %144 = vector.extract_strided_slice %3 {offsets = [0, 176], sizes = [16, 16], strides = [1, 1]} : vector<16x192xf32> to vector<16x16xf32>
    %145 = arith.mulf %142, %142 : vector<16x16xf32>
    %cst_50 = arith.constant dense<0.000000e+00> : vector<16xf32>
    %146 = vector.multi_reduction <add>, %145, %cst_50 [1] : vector<16x16xf32> to vector<16xf32>
    %147 = vector.shape_cast %146 : vector<16xf32> to vector<16x1xf32>
    %cst_51 = arith.constant 1.000000e-24 : f32
    %148 = vector.broadcast %cst_51 : f32 to vector<16x1xf32>
    %149 = arith.maximumf %147, %148 : vector<16x1xf32>
    %150 = math.rsqrt %149 : vector<16x1xf32>
    %151 = vector.broadcast %150 : vector<16x1xf32> to vector<16x16xf32>
    %152 = arith.mulf %142, %151 : vector<16x16xf32>
    %c3 = arith.constant 3 : index
    %c0_52 = arith.constant 0 : index
    %153 = vector.load %arg4[%c3, %c0_52] : memref<4x16xf32, #tpu.memory_space<vmem>>, vector<1x16xf32>
    %154 = vector.broadcast %153 : vector<1x16xf32> to vector<16x16xf32>
    %155 = arith.mulf %152, %154 : vector<16x16xf32>
    %156 = arith.mulf %143, %143 : vector<16x16xf32>
    %cst_53 = arith.constant dense<0.000000e+00> : vector<16xf32>
    %157 = vector.multi_reduction <add>, %156, %cst_53 [1] : vector<16x16xf32> to vector<16xf32>
    %158 = vector.shape_cast %157 : vector<16xf32> to vector<16x1xf32>
    %cst_54 = arith.constant 1.000000e-24 : f32
    %159 = vector.broadcast %cst_54 : f32 to vector<16x1xf32>
    %160 = arith.maximumf %158, %159 : vector<16x1xf32>
    %161 = math.rsqrt %160 : vector<16x1xf32>
    %162 = vector.broadcast %161 : vector<16x1xf32> to vector<16x16xf32>
    %163 = arith.mulf %143, %162 : vector<16x16xf32>
    %c3_55 = arith.constant 3 : index
    %c0_56 = arith.constant 0 : index
    %164 = vector.load %arg5[%c3_55, %c0_56] : memref<4x16xf32, #tpu.memory_space<vmem>>, vector<1x16xf32>
    %165 = vector.broadcast %164 : vector<1x16xf32> to vector<16x16xf32>
    %166 = arith.mulf %163, %165 : vector<16x16xf32>
    %167 = arith.mulf %155, %4 : vector<16x16xf32>
    %cst_57 = arith.constant dense<0.000000e+00> : vector<16x16xf32>
    %168 = tpu.matmul %155, %6, %cst_57 {dimension_numbers = #tpu.dot_dimension_numbers<[1], [0], [0], [1], [0, 0, 1, 1], [], []>} : vector<16x16xf32>, vector<16x16xf32>, vector<16x16xf32> -> vector<16x16xf32>
    %169 = arith.mulf %168, %5 : vector<16x16xf32>
    %170 = arith.addf %167, %169 : vector<16x16xf32>
    %171 = arith.mulf %166, %4 : vector<16x16xf32>
    %cst_58 = arith.constant dense<0.000000e+00> : vector<16x16xf32>
    %172 = tpu.matmul %166, %6, %cst_58 {dimension_numbers = #tpu.dot_dimension_numbers<[1], [0], [0], [1], [0, 0, 1, 1], [], []>} : vector<16x16xf32>, vector<16x16xf32>, vector<16x16xf32> -> vector<16x16xf32>
    %173 = arith.mulf %172, %5 : vector<16x16xf32>
    %174 = arith.addf %171, %173 : vector<16x16xf32>
    %cst_59 = arith.constant dense<0.000000e+00> : vector<16x16xf32>
    %175 = tpu.matmul %170, %174, %cst_59 {dimension_numbers = #tpu.dot_dimension_numbers<[1], [1], [0], [0], [0, 0, 1, 0], [], []>} : vector<16x16xf32>, vector<16x16xf32>, vector<16x16xf32> -> vector<16x16xf32>
    %cst_60 = arith.constant dense<0xFF800000> : vector<16xf32>
    %176 = vector.multi_reduction <maximumf>, %175, %cst_60 [1] : vector<16x16xf32> to vector<16xf32>
    %177 = vector.shape_cast %176 : vector<16xf32> to vector<16x1xf32>
    %178 = vector.broadcast %177 : vector<16x1xf32> to vector<16x16xf32>
    %179 = arith.subf %175, %178 : vector<16x16xf32>
    %180 = math.exp %179 : vector<16x16xf32>
    %cst_61 = arith.constant dense<0.000000e+00> : vector<16x16xf32>
    %181 = tpu.matmul %180, %144, %cst_61 {dimension_numbers = #tpu.dot_dimension_numbers<[1], [0], [0], [1], [0, 0, 1, 1], [], []>} : vector<16x16xf32>, vector<16x16xf32>, vector<16x16xf32> -> vector<16x16xf32>
    %cst_62 = arith.constant dense<0.000000e+00> : vector<16xf32>
    %182 = vector.multi_reduction <add>, %180, %cst_62 [1] : vector<16x16xf32> to vector<16xf32>
    %183 = vector.shape_cast %182 : vector<16xf32> to vector<16x1xf32>
    %184 = tpu.reciprocal %183 {approx = true} : vector<16x1xf32> -> vector<16x1xf32>
    %185 = vector.broadcast %184 : vector<16x1xf32> to vector<16x16xf32>
    %186 = arith.mulf %181, %185 : vector<16x16xf32>
    %187 = tpu.concatenate %51, %96, %141, %186 in 1 : vector<16x16xf32>, vector<16x16xf32>, vector<16x16xf32>, vector<16x16xf32> -> vector<16x64xf32>
    %c0_63 = arith.constant 0 : index
    %c0_64 = arith.constant 0 : index
    %188 = vector.load %arg3[%c0_63, %c0_64] : memref<32x64xf32, #tpu.memory_space<vmem>>, vector<32x64xf32>
    %cst_65 = arith.constant dense<0.000000e+00> : vector<16x32xf32>
    %189 = tpu.matmul %187, %188, %cst_65 {dimension_numbers = #tpu.dot_dimension_numbers<[1], [1], [0], [0], [0, 0, 1, 0], [], []>} : vector<16x64xf32>, vector<32x64xf32>, vector<16x32xf32> -> vector<16x32xf32>
    %c0_66 = arith.constant 0 : index
    %c0_67 = arith.constant 0 : index
    %c0_68 = arith.constant 0 : index
    %190 = vector.load %arg9[%c0_66, %c0_67, %c0_68] : memref<1x16x32xf32, #tpu.memory_space<vmem>>, vector<1x16x32xf32>
    %191 = vector.shape_cast %190 : vector<1x16x32xf32> to vector<16x32xf32>
    %192 = vector.shape_cast %189 : vector<16x32xf32> to vector<1x16x32xf32>
    tpu.vector_store %arg9[%c0_66, %c0_67, %c0_68], %192 {strides = array<i32>} : memref<1x16x32xf32, #tpu.memory_space<vmem>>, vector<1x16x32xf32>,
    return
  }
  func.func @transform_0(%arg0: i32) -> (i32, i32, i32) {
    %c0_i32 = arith.constant 0 : i32
    %c0_i32_0 = arith.constant 0 : i32
    %c0_i32_1 = arith.constant 0 : i32
    return %arg0, %c0_i32, %c0_i32_0 : i32, i32, i32
  }
  func.func @transform_1(%arg0: i32) -> (i32, i32) {
    %c0_i32 = arith.constant 0 : i32
    %c0_i32_0 = arith.constant 0 : i32
    %c0_i32_1 = arith.constant 0 : i32
    return %c0_i32, %c0_i32_0 : i32, i32
  }
  func.func @transform_2(%arg0: i32) -> (i32, i32) {
    %c0_i32 = arith.constant 0 : i32
    %c0_i32_0 = arith.constant 0 : i32
    %c0_i32_1 = arith.constant 0 : i32
    return %c0_i32, %c0_i32_0 : i32, i32
  }
  func.func @transform_3(%arg0: i32) -> (i32, i32) {
    %c0_i32 = arith.constant 0 : i32
    %c0_i32_0 = arith.constant 0 : i32
    %c0_i32_1 = arith.constant 0 : i32
    return %c0_i32, %c0_i32_0 : i32, i32
  }
  func.func @transform_4(%arg0: i32) -> (i32, i32) {
    %c0_i32 = arith.constant 0 : i32
    %c0_i32_0 = arith.constant 0 : i32
    %c0_i32_1 = arith.constant 0 : i32
    return %c0_i32, %c0_i32_0 : i32, i32
  }
  func.func @transform_5(%arg0: i32) -> (i32, i32) {
    %c0_i32 = arith.constant 0 : i32
    %c0_i32_0 = arith.constant 0 : i32
    %c0_i32_1 = arith.constant 0 : i32
    return %c0_i32, %c0_i32_0 : i32, i32
  }
  func.func @transform_6(%arg0: i32) -> (i32, i32) {
    %c0_i32 = arith.constant 0 : i32
    %c0_i32_0 = arith.constant 0 : i32
    %c0_i32_1 = arith.constant 0 : i32
    return %c0_i32, %c0_i32_0 : i32, i32
  }
  func.func @transform_7(%arg0: i32) -> (i32, i32) {
    %c0_i32 = arith.constant 0 : i32
    %c0_i32_0 = arith.constant 0 : i32
    %c0_i32_1 = arith.constant 0 : i32
    return %c0_i32, %c0_i32_0 : i32, i32
  }
  func.func @transform_8(%arg0: i32) -> (i32, i32, i32) {
    %c0_i32 = arith.constant 0 : i32
    %c0_i32_0 = arith.constant 0 : i32
    %c0_i32_1 = arith.constant 0 : i32
    return %arg0, %c0_i32, %c0_i32_0 : i32, i32, i32
  }
}

</mosaic_0001>

<bundles_post_ra>
// kernel: tpu_custom_call.1
= control target key start
LH: loop header
LB: loop body
LE: loop exit
PB: predicated region body
PF: predicated region fallthrough
CT: control target
= control target key end

     0   :  { %13 = vsyncpa [#allocation3], 0  ;;  %s3745_s0 = inlined_call_operand.vmem [shape: f32[2,16,32], index: 0, kind: input, shape index: {}]   ;;  %s3746_s1 = inlined_call_operand.vmem [shape: f32[192,32], index: 1, kind: input, shape index: {}]   ;;  %s3747_s2 = inlined_call_operand.vmem [shape: f32[32,64], index: 2, kind: input, shape index: {}]   ;;  %s3748_s3 = inlined_call_operand.vmem [shape: f32[4,16], index: 3, kind: input, shape index: {}]   ;;  %s3749_s4 = inlined_call_operand.vmem [shape: f32[4,16], index: 4, kind: input, shape index: {}]   ;;  %s3750_s5 = inlined_call_operand.vmem [shape: f32[16,16], index: 5, kind: input, shape index: {}]   ;;  %s3751_s6 = inlined_call_operand.vmem [shape: f32[16,16], index: 6, kind: input, shape index: {}]   ;;  %s3752_s7 = inlined_call_operand.vmem [shape: f32[16,16], index: 7, kind: input, shape index: {}]   ;;  %s3753_s8 = inlined_call_operand.hbm [shape: f32[2,16,32], index: 8, kind: output, shape index: {}]  }
   0x1   :  { %15 = vsyncpa [#allocation3 + $0x1], 0  ;;  %s3076_s27 = smov 0   ;;  %s3078_s28 = smov 0  }
   0x2   :  { %s3080_s29 = smov 0   ;;  %s3082_s30 = smov 0  }
   0x3 LB: > { %s3097_s9 = sadd.s32 4294967295, %s3018_s30   ;;  %s2558_s10 = sadd.s32 4294967294, %s3018_s30   ;;  %s3018_s30 = sphi %s3082_s30, %s3759_s30   ;;  %s3014_s29 = sphi %s3080_s29, %s3758_s29   ;;  %s3010_s28 = sphi %s3078_s28, %s3757_s28   ;;  %s3006_s27 = sphi %s3076_s27, %s3756_s27  }
   0x4   : > { %s3101_s11 = sadd.s32 1, %s3018_s30   ;;  %s201_s12 = sadd.s32 1, %s3014_s29 }
   0x5   : > { %s198_s13 = ssub.s32 %s3018_s30, %s3101_s11  ;;  %p211_p0 = scmp.ne.s32.totalorder %s3014_s29, %s3010_s28 }
   0x6   : > { %p199_p1 = scmp.eq.s32.totalorder %s198_s13, 0  ;;  %p212_p2 = scmp.eq.s32.totalorder %s3097_s9, 1 }
   0x7   : > { %p217_p3 = scmp.ne.s32.totalorder %s3010_s28, %s3006_s27  ;;  %p218_p4 = scmp.eq.s32.totalorder %s2558_s10, 1 }
   0x8   : > { %s3112_s14 = scalar_select %p199_p1, %s3014_s29, %s201_s12  }
   0x9   : > { %p3114_p5 = por %p212_p2, %p211_p0  ;;  %p3118_p6 = por %p218_p4, %p217_p3 }
   0xa   : > { %p2561_p7 = scmp.ge.s32.totalorder %s3018_s30, 1  ;;  %p265_p8 = scmp.lt.s32.totalorder %s3018_s30, 3 }
   0xc   : > { %p266_p9 = pnand %p2561_p7, %p265_p8 }
   0xd   : > { %p299_p10 = scmp.lt.s32.totalorder (!%p266_p9), %s3097_s9, 1  ;;  %s3021_s18 = smov (!%p266_p9), 64  }
   0xe   : > { %269 = sbr.rel (%p266_p9) target bundleno = 4405 (0x1135), region = 52  ;;  %s3022_s23 = smov (!%p266_p9), 48  }
   0xf   : > { %s3023_s24 = smov (!%p266_p9), 112   ;;  %s3024_s26 = smov (!%p266_p9), 80  }
  0x10   : > { %s3025_s13 = smov (!%p266_p9), 16   ;;  %s3027_s19 = smov (!%p266_p9), 32  }
  0x11   : > { %s2651_s20 = sshll.u32 (!%p266_p9), %s3097_s9, 8 }
  0x13   : > { %v321_v0 = vld [vmem:[%s3746_s1 + $0x78] sm:$0xff]  ;;  %vm330_vm0 = vcmask 261120   ;;  %v3020_v1 = vmov 0.0   ;;  %v320_v2 = vld [vmem:[%s3746_s1 + $0x70] sm:$0xff]  ;;  %v319_v3 = vld [vmem:[%s3746_s1 + $0x68] sm:$0xff]  ;;  %s300_s22 = scalar_select %p299_p10, %s3097_s9, 1 }
  0x14   : > { %409 = vmatprep.subr.mxu0 %v3020_v1  ;;  %473 = vmatprep.mubr.f32.mxu0 %v3020_v1  ;;  %v318_v4 = vld [vmem:[%s3746_s1 + $0x60] sm:$0xff]  ;;  %v317_v5 = vld [vmem:[%s3746_s1 + $0x58] sm:$0xff]  ;;  %v316_v6 = vld [vmem:[%s3746_s1 + $0x50] sm:$0xff]  ;;  %vm494_vm1 = vcmask 130048   ;;  %vm2386_vm2 = vcmask 523264   ;;  %vm2379_vm3 = vcmask 392192  }
  0x15   : > { %2565 = vmatpush1.xpose.msk.msra.mxu0 %vm330_vm0, %v321_v0  ;;  %v315_v7 = vld [vmem:[%s3746_s1 + $0x48] sm:$0xff]  ;;  %v314_v8 = vld [vmem:[%s3746_s1 + $0x40] sm:$0xff]  ;;  %v313_v9 = vld [vmem:[%s3746_s1 + $0x38] sm:$0xff]  ;;  %s2650_s25 = sshll.u32 %s300_s22, 4  ;;  %s3028_s9 = smov [#allocation2]  }
  0x16   : > { %411 = vmatprep.subr.mxu0 %v3020_v1  ;;  %v312_v10 = vld [vmem:[%s3746_s1 + $0x30] sm:$0xff]  ;;  %v311_v11 = vld [vmem:[%s3746_s1 + $0x28] sm:$0xff]  ;;  %v310_v12 = vld [vmem:[%s3746_s1 + $0x20] sm:$0xff]  ;;  %s303_s17 = scalar_lea.vmem %s3745_s0, %s2650_s25  ;;  %s2962_s22 = sshll.u32 %s3028_s9, 4  ;;  %s2963_s22 = int_to_ptr.vmem [resolvable:$false] %s2962_s22 }
  0x17   : > { %v309_v13 = vld [vmem:[%s3746_s1 + $0x18] sm:$0xff]  ;;  %v308_v14 = vld [vmem:[%s3746_s1 + $0x10] sm:$0xff]  ;;  %v307_v15 = vld [vmem:[%s3746_s1 + $0x8] sm:$0xff] }
  0x18   : > { %v306_v16 = vld [vmem:[%s3746_s1] sm:$0xff]  ;;  %v329_v17 = vld [vmem:[%s3746_s1 + $0xb8] sm:$0xff]  ;;  %v328_v18 = vld [vmem:[%s3746_s1 + $0xb0] sm:$0xff] }
  0x19   : > { %2566 = vmatpush1.xpose.msk.msra.mxu0 %vm330_vm0, %v320_v2  ;;  %v327_v19 = vld [vmem:[%s3746_s1 + $0xa8] sm:$0xff]  ;;  %v326_v20 = vld [vmem:[%s3746_s1 + $0xa0] sm:$0xff]  ;;  %v325_v21 = vld [vmem:[%s3746_s1 + $0x98] sm:$0xff] }
  0x1a   : > { %413 = vmatprep.subr.mxu0 %v3020_v1  ;;  %v324_v22 = vld [vmem:[%s3746_s1 + $0x90] sm:$0xff]  ;;  %v323_v23 = vld [vmem:[%s3746_s1 + $0x88] sm:$0xff]  ;;  %v322_v24 = vld [vmem:[%s3746_s1 + $0x80] sm:$0xff] }
  0x1b   : > { %v304_v25 = vld [vmem:[%s303_s17] sm:$0xff]  ;;  %v305_v26 = vld [vmem:[%s303_s17 + $0x8] sm:$0xff]  ;;  %s3026_s17 = smov 96  }
  0x1c   : > { %v2592_v32 = vld [vmem:[%s3749_s4] ss:$0 sm:$0xff]  ;;  %v3284_v39 = vld [vmem:[%s3752_s7 + $0x8] sm:$0xff] }
  0x1d   : > { %2567 = vmatpush1.xpose.msk.msra.mxu0 %vm330_vm0, %v319_v3  ;;  %v3289_v40 = vld [vmem:[%s3752_s7] sm:$0xff]  ;;  %2722 = vmatprep.subr.mxu1 %v3284_v39  ;;  %v3308_v63 = vld [vmem:[%s3750_s5 + $0x8] sm:$0xff] }
  0x1e   : > { %415 = vmatprep.subr.mxu0 %v3020_v1  ;;  %2723 = vmatpush3.msra.mxu1 %v3284_v39  ;;  %v2591_v60 = vld [vmem:[%s3748_s3] ss:$0 sm:$0xff] }
  0x1f   : > { %2724 = vmatprep.subr.mxu1 %v3289_v40  ;;  %v3322_v2 = vld [vmem:[%s3750_s5] sm:$0xff] }
  0x20   : > { %2725 = vmatpush3.msra.mxu1 %v3289_v40 }
  0x21   : > { %2568 = vmatpush1.xpose.msk.msra.mxu0 %vm330_vm0, %v318_v4  ;;  %2729 = vmatprep.subr.mxu1 %v3284_v39  ;;  %v3327_v4 = vld [vmem:[%s3751_s6] sm:$0xff] }
  0x22   : > { %417 = vmatprep.subr.mxu0 %v3020_v1 }
  0x25   : > { %2569 = vmatpush1.xpose.msk.msra.mxu0 %vm330_vm0, %v317_v5 }
  0x26   : > { %419 = vmatprep.subr.mxu0 %v3020_v1 }
  0x29   : > { %2570 = vmatpush1.xpose.msk.msra.mxu0 %vm330_vm0, %v316_v6 }
  0x2a   : > { %421 = vmatprep.subr.mxu0 %v3020_v1 }
  0x2d   : > { %2571 = vmatpush1.xpose.msk.msra.mxu0 %vm330_vm0, %v315_v7 }
  0x2e   : > { %423 = vmatprep.subr.mxu0 %v3020_v1 }
  0x31   : > { %2572 = vmatpush1.xpose.msk.msra.mxu0 %vm330_vm0, %v314_v8 }
  0x32   : > { %425 = vmatprep.subr.mxu0 %v3020_v1 }
  0x35   : > { %2573 = vmatpush1.xpose.msk.msra.mxu0 %vm330_vm0, %v313_v9  ;;  %v3335_v9 = vld [vmem:[%s3751_s6 + $0x8] sm:$0xff] }
  0x36   : > { %427 = vmatprep.subr.mxu0 %v3020_v1 }
  0x39   : > { %2574 = vmatpush1.xpose.msk.msra.mxu0 %vm330_vm0, %v312_v10 }
  0x3a   : > { %429 = vmatprep.subr.mxu0 %v3020_v1 }
  0x3d   : > { %2575 = vmatpush1.xpose.msk.msra.mxu0 %vm330_vm0, %v311_v11 }
  0x3e   : > { %431 = vmatprep.subr.mxu0 %v3020_v1 }
  0x41   : > { %2576 = vmatpush1.xpose.msk.msra.mxu0 %vm330_vm0, %v310_v12 }
  0x42   : > { %433 = vmatprep.subr.mxu0 %v3020_v1 }
  0x45   : > { %2577 = vmatpush1.xpose.msk.msra.mxu0 %vm330_vm0, %v309_v13 }
  0x46   : > { %435 = vmatprep.subr.mxu0 %v3020_v1 }
  0x49   : > { %2578 = vmatpush1.xpose.msk.msra.mxu0 %vm330_vm0, %v308_v14 }
  0x4a   : > { %437 = vmatprep.subr.mxu0 %v3020_v1 }
  0x4d   : > { %2579 = vmatpush1.xpose.msk.msra.mxu0 %vm330_vm0, %v307_v15 }
  0x4e   : > { %439 = vmatprep.subr.mxu0 %v3020_v1 }
  0x51   : > { %2580 = vmatpush1.xpose.msk.msra.mxu0 %vm330_vm0, %v306_v16 }
  0x52   : > { %457 = vmatprep.subr.mxu0 %v3020_v1 }
  0x55   : > { %2581 = vmatpush2.xpose.msk.msra.mxu0 %vm330_vm0, %v329_v17 }
  0x56   : > { %459 = vmatprep.subr.mxu0 %v3020_v1 }
  0x59   : > { %2582 = vmatpush2.xpose.msk.msra.mxu0 %vm330_vm0, %v328_v18 }
  0x5a   : > { %461 = vmatprep.subr.mxu0 %v3020_v1 }
  0x5d   : > { %2583 = vmatpush2.xpose.msk.msra.mxu0 %vm330_vm0, %v327_v19 }
  0x5e   : > { %463 = vmatprep.subr.mxu0 %v3020_v1 }
  0x61   : > { %2584 = vmatpush2.xpose.msk.msra.mxu0 %vm330_vm0, %v326_v20 }
  0x62   : > { %465 = vmatprep.subr.mxu0 %v3020_v1 }
  0x65   : > { %2585 = vmatpush2.xpose.msk.msra.mxu0 %vm330_vm0, %v325_v21 }
  0x66   : > { %467 = vmatprep.subr.mxu0 %v3020_v1 }
  0x69   : > { %2586 = vmatpush2.xpose.msk.msra.mxu0 %vm330_vm0, %v324_v22 }
  0x6a   : > { %469 = vmatprep.subr.mxu0 %v3020_v1 }
  0x6d   : > { %2587 = vmatpush2.xpose.msk.msra.mxu0 %vm330_vm0, %v323_v23 }
  0x6e   : > { %471 = vmatprep.subr.mxu0 %v3020_v1 }
  0x71   : > { %2588 = vmatpush2.xpose.msk.msra.mxu0 %vm330_vm0, %v322_v24 }
  0x74   : > { %2589 = vmatmul.mubr.msk.f32.vlgmr.msra.gmra.mxu0 %vm330_vm0, %v304_v25 }
  0x75   : > { %479 = vmatprep.mubr.f32.mxu0 %v3020_v1 }
  0x78   : > { %2590 = vmatmul.mubr.msk.f32.gmra.mxu0 %vm330_vm0, %v305_v26 }
 0x134   : > { %v3253_v27 = vpop.f32.mrf.mxu0 }
 0x135   : > { %v3257_v28 = vmul.f32 %v3253_v27, %v3253_v27 }
 0x136   : > { %v3259_v29 = vpop.f32.mrf.mxu0 }
 0x137   : > { %516 = vrot.lane.b32.xlu0 %v3257_v28, %s3021_s18  ;;  %v495_v38 = vsel %vm494_vm1, %v3257_v28, 0.0 }
 0x138   : > { %v3263_v30 = vpop.f32.mrf.mxu0 }
 0x139   : > { %v3267_v31 = vmul.f32 %v3263_v30, %v3263_v30 }
 0x13a   : > { %v3358_v26 = vpop.f32.mrf.mxu0 }
 0x13b   : > { %518 = vrot.lane.b32.xlu0 %v3267_v31, %s3021_s18  ;;  %v498_v33 = vsel %vm494_vm1, %v3267_v31, 0.0 }
 0x13f   : > { %540 = vrot.lane.b32.xlu0 %v2592_v32, %s3021_s18 }
 0x15e   : > { %499 = vadd.xlane.f32.xlu0 %v498_v33 }
 0x1a9   : > { %v517_v34 = vpop.permute.xlu0 %516 }
 0x1aa   : > { %v522_v35 = vsel %vm494_vm1, %v517_v34, 0.0 }
 0x1ab   : > { %523 = vadd.xlane.f32.xlu1 %v522_v35 }
 0x1ad   : > { %v519_v36 = vpop.permute.xlu0 %518 }
 0x1ae   : > { %v525_v37 = vsel %vm494_vm1, %v519_v36, 0.0 }
 0x1af   : > { %526 = vadd.xlane.f32.xlu1 %v525_v37 }
 0x1b1   : > { %v541_v41 = vpop.permute.xlu0 %540 }
 0x1b3   : > { %496 = vadd.xlane.f32.xlu1 %v495_v38 }
 0x1e7   : > { %v500_v43 = vpop.xlane.xlu0 %499 }
 0x1e8   : > { %v502_v45 = vmax.f32 %v500_v43, 1e-24  ;;  %v2604_v43 = vld [vmem:[%s3749_s4 + $0x1] ss:$0 sm:$0xff] }
 0x234   : > { %v524_v42 = vpop.xlane.xlu1 %523 }
 0x235   : > { %v528_v44 = vmax.f32 %v524_v42, 1e-24 }
 0x237   : > { %2894 = vrsqrt.f32 %v528_v44  ;;  %v2603_v44 = vld [vmem:[%s3748_s3 + $0x1] ss:$0 sm:$0xff] }
 0x238   : > { %v527_v46 = vpop.xlane.xlu1 %526 }
 0x239   : > { %v529_v47 = vmax.f32 %v527_v46, 1e-24 }
 0x23b   : > { %2896 = vrsqrt.f32 %v529_v47 }
 0x23c   : > { %2898 = vrsqrt.f32 %v502_v45  ;;  %v497_v48 = vpop.xlane.xlu1 %496 }
 0x23d   : > { %v501_v49 = vmax.f32 %v497_v48, 1e-24 }
 0x23f   : > { %2900 = vrsqrt.f32 %v501_v49 }
 0x244   : > { %v2895_v50 = vpop.eup %2894 }
 0x245   : > { %v532_v51 = vmul.f32 %v2895_v50, %v3253_v27 }
 0x247   : > { %v543_v52 = vmul.f32 %v541_v41, %v532_v51 }
 0x248   : > { %v2897_v53 = vpop.eup %2896 }
 0x249   : > { %v2899_v54 = vpop.eup %2898  ;;  %644 = vrot.lane.b32.xlu1 %v543_v52, %s3021_s18  ;;  %v533_v55 = vmul.f32 %v2897_v53, %v3263_v30 }
 0x24a   : > { %v506_v58 = vmul.f32 %v2899_v54, %v3263_v30 }
 0x24b   : > { %v544_v56 = vmul.f32 %v541_v41, %v533_v55 }
 0x24c   : > { %v2901_v57 = vpop.eup %2900  ;;  %v513_v62 = vmul.f32 %v2591_v60, %v506_v58 }
 0x24d   : > { %646 = vrot.lane.b32.xlu1 %v544_v56, %s3021_s18  ;;  %v505_v59 = vmul.f32 %v2901_v57, %v3253_v27 }
 0x24e   : > { %v546_v25 = vmul.f32 %v513_v62, %v3308_v63 }
 0x24f   : > { %v512_v61 = vmul.f32 %v2591_v60, %v505_v59 }
 0x251   : > { %2726 = vmatprep.mubr.msk.f32.mxu1 %vm494_vm1, %v512_v61  ;;  %636 = vrot.lane.b32.xlu1 %v3308_v63, %s3021_s18  ;;  %v545_v6 = vmul.f32 %v512_v61, %v3322_v2 }
 0x252   : > { %2727 = vmatmul.mubr.msk.f32.vlgmr.msra.gmra.mxu1 %vm494_vm1, %v513_v62 }
 0x253   : > { %2730 = vmatpush3.msra.mxu1 %v3284_v39 }
 0x254   : > { %2731 = vmatprep.subr.mxu1 %v3289_v40 }
 0x255   : > { %2732 = vmatpush3.msra.mxu1 %v3289_v40 }
 0x2bb   : > { %v645_v0 = vpop.permute.xlu1 %644 }
 0x2bc   : > { %2733 = vmatprep.mubr.msk.f32.mxu1 %vm494_vm1, %v645_v0 }
 0x2bf   : > { %v647_v1 = vpop.permute.xlu1 %646 }
 0x2c0   : > { %2734 = vmatmul.mubr.msk.f32.vlgmr.msra.gmra.mxu1 %vm494_vm1, %v647_v1 }
 0x2c3   : > { %v637_v14 = vpop.permute.xlu1 %636 }
 0x2c4   : > { %v641_v15 = vmul.f32 %v637_v14, %v544_v56 }
 0x312   : > { %v2728_v3 = vpop.f32.mrf.mxu1 }
 0x313   : > { %v629_v23 = vmul.f32 %v2728_v3, %v3335_v9 }
 0x314   : > { %v619_v5 = vpop.f32.mrf.mxu1 }
 0x315   : > { %v628_v7 = vmul.f32 %v619_v5, %v3327_v4  ;;  %v631_v32 = vadd.f32 %v629_v23, %v546_v25 }
 0x317   : > { %v630_v8 = vadd.f32 %v628_v7, %v545_v6 }
 0x319   : > { %2740 = vmatprep.mubr.msk.f32.mxu1 %vm494_vm1, %v630_v8 }
 0x380   : > { %v2735_v10 = vpop.f32.mrf.mxu1 }
 0x381   : > { %v728_v11 = vmul.f32 %v2735_v10, %v3335_v9 }
 0x382   : > { %v718_v12 = vpop.f32.mrf.mxu1 }
 0x383   : > { %v727_v13 = vmul.f32 %v718_v12, %v3327_v4  ;;  %733 = vrot.lane.b32.xlu1 %v728_v11, %s3021_s18 }
 0x385   : > { %731 = vrot.lane.b32.xlu0 %v727_v13, %s3021_s18 }
 0x387   : > { %634 = vrot.lane.b32.xlu1 %v3322_v2, %s3021_s18 }
 0x389   : > { %964 = vrot.lane.b32.xlu0 %v3267_v31, %s3022_s23 }
 0x3f5   : > { %v734_v16 = vpop.permute.xlu1 %733 }
 0x3f6   : > { %v738_v17 = vadd.f32 %v734_v16, %v641_v15 }
 0x3f7   : > { %v732_v20 = vpop.permute.xlu0 %731 }
 0x3f8   : > { %743 = vrot.lane.b32.xlu1 %v738_v17, %s3021_s18 }
 0x3f9   : > { %v635_v18 = vpop.permute.xlu1 %634 }
 0x3fa   : > { %v640_v19 = vmul.f32 %v635_v18, %v543_v52 }
 0x3fb   : > { %v965_v35 = vpop.permute.xlu0 %964 }
 0x3fc   : > { %v737_v21 = vadd.f32 %v732_v20, %v640_v19  ;;  %v971_v38 = vsel %vm494_vm1, %v965_v35, 0.0 }
 0x3fe   : > { %741 = vrot.lane.b32.xlu1 %v737_v21, %s3021_s18 }
 0x402   : > { %933 = vrot.lane.b32.xlu1 %v3257_v28, %s3023_s24 }
 0x406   : > { %935 = vrot.lane.b32.xlu1 %v3267_v31, %s3023_s24 }
 0x40a   : > { %962 = vrot.lane.b32.xlu1 %v3257_v28, %s3022_s23 }
 0x46a   : > { %v744_v22 = vpop.permute.xlu1 %743 }
 0x46b   : > { %2736 = vmatprep.subr.msk.mxu1 %vm494_vm1, %v744_v22 }
 0x46c   : > { %2737 = vmatpush3.xpose.msk.msra.mxu1 %vm494_vm1, %v744_v22 }
 0x470   : > { %v742_v24 = vpop.permute.xlu1 %741 }
 0x471   : > { %2738 = vmatprep.subr.msk.mxu1 %vm494_vm1, %v742_v24 }
 0x472   : > { %2739 = vmatpush3.xpose.msk.msra.mxu1 %vm494_vm1, %v742_v24 }
 0x473   : > { %2743 = vmatprep.subr.mxu1 %v3358_v26 }
 0x474   : > { %v934_v33 = vpop.permute.xlu1 %933 }
 0x475   : > { %2741 = vmatmul.mubr.msk.f32.vlgmr.msra.gmra.mxu1 %vm494_vm1, %v631_v32  ;;  %v939_v34 = vsel %vm494_vm1, %v934_v33, 0.0 }
 0x476   : > { %940 = vadd.xlane.f32.xlu1 %v939_v34  ;;  %2744 = vmatpush3.msra.mxu1 %v3358_v26 }
 0x477   : > { %2745 = vmatprep.subr.mxu1 %v3259_v29 }
 0x478   : > { %v936_v36 = vpop.permute.xlu1 %935  ;;  %2746 = vmatpush3.msra.mxu1 %v3259_v29 }
 0x479   : > { %v942_v37 = vsel %vm494_vm1, %v936_v36, 0.0  ;;  %2750 = vmatprep.subr.mxu1 %v3284_v39 }
 0x47a   : > { %943 = vadd.xlane.f32.xlu0 %v942_v37  ;;  %972 = vadd.xlane.f32.xlu1 %v971_v38 }
 0x47c   : > { %v963_v41 = vpop.permute.xlu1 %962 }
 0x47d   : > { %v968_v42 = vsel %vm494_vm1, %v963_v41, 0.0 }
 0x47e   : > { %969 = vadd.xlane.f32.xlu0 %v968_v42 }
 0x48b   : > { %986 = vrot.lane.b32.xlu1 %v2604_v43, %s3024_s26 }
 0x494   : > { %957 = vrot.lane.b32.xlu0 %v2603_v44, %s3025_s13 }
 0x4ff   : > { %v941_v46 = vpop.xlane.xlu1 %940 }
 0x500   : > { %v945_v49 = vmax.f32 %v941_v46, 1e-24 }
 0x503   : > { %v944_v45 = vpop.xlane.xlu0 %943  ;;  %v973_v50 = vpop.xlane.xlu1 %972 }
 0x504   : > { %v946_v47 = vmax.f32 %v944_v45, 1e-24  ;;  %v975_v54 = vmax.f32 %v973_v50, 1e-24 }
 0x506   : > { %2902 = vrsqrt.f32 %v946_v47 }
 0x507   : > { %v970_v48 = vpop.xlane.xlu0 %969  ;;  %2904 = vrsqrt.f32 %v945_v49  ;;  %v987_v7 = vpop.permute.xlu1 %986 }
 0x508   : > { %v974_v51 = vmax.f32 %v970_v48, 1e-24 }
 0x50a   : > { %2906 = vrsqrt.f32 %v974_v51 }
 0x50b   : > { %2908 = vrsqrt.f32 %v975_v54  ;;  %v958_v62 = vpop.permute.xlu0 %957 }
 0x513   : > { %v2903_v57 = vpop.eup %2902 }
 0x514   : > { %v2905_v58 = vpop.eup %2904  ;;  %v950_v59 = vmul.f32 %v2903_v57, %v3263_v30 }
 0x515   : > { %v949_v61 = vmul.f32 %v2905_v58, %v3253_v27 }
 0x516   : > { %v3383_v1 = vmul.f32 %v958_v62, %v950_v59 }
 0x517   : > { %v2907_v60 = vpop.eup %2906  ;;  %v960_v5 = vmul.f32 %v958_v62, %v949_v61 }
 0x518   : > { %v2909_v0 = vpop.eup %2908  ;;  %v978_v3 = vmul.f32 %v2907_v60, %v3253_v27 }
 0x519   : > { %v979_v6 = vmul.f32 %v2909_v0, %v3263_v30 }
 0x51a   : > { %v989_v8 = vmul.f32 %v987_v7, %v978_v3 }
 0x51b   : > { %v990_v10 = vmul.f32 %v987_v7, %v979_v6 }
 0x535   : > { %v2742_v52 = vpop.f32.mrf.mxu1 }
 0x536   : > { %v833_v53 = vsel %vm494_vm1, %v2742_v52, -inf }
 0x537   : > { %834 = vmax.xlane.f32.xlu0 %v833_v53  ;;  %v821_v55 = vpop.f32.mrf.mxu1 }
 0x538   : > { %v830_v56 = vsel %vm494_vm1, %v821_v55, -inf }
 0x539   : > { %831 = vmax.xlane.f32.xlu1 %v830_v56 }
 0x54a   : > { %1003 = vrot.lane.b32.xlu1 %v3383_v1, %s3023_s24 }
 0x54d   : > { %1001 = vrot.lane.b32.xlu0 %v960_v5, %s3023_s24 }
 0x54e   : > { %1106 = vrot.lane.b32.xlu1 %v989_v8, %s3022_s23 }
 0x551   : > { %1108 = vrot.lane.b32.xlu0 %v990_v10, %s3022_s23 }
 0x552   : > { %1098 = vrot.lane.b32.xlu1 %v3308_v63, %s3024_s26 }
 0x555   : > { %993 = vrot.lane.b32.xlu0 %v3308_v63, %s3025_s13 }
 0x556   : > { %1096 = vrot.lane.b32.xlu1 %v3322_v2, %s3024_s26 }
 0x55a   : > { %991 = vrot.lane.b32.xlu1 %v3322_v2, %s3025_s13 }
 0x5c0   : > { %v835_v11 = vpop.xlane.xlu0 %834 }
 0x5c1   : > { %v837_v12 = vsub.f32 %v2742_v52, %v835_v11 }
 0x5c2   : > { %v832_v13 = vpop.xlane.xlu1 %831 }
 0x5c3   : > { %v836_v14 = vsub.f32 %v821_v55, %v832_v13  ;;  %v840_v15 = vmul.f32 1.442695, %v837_v12 }
 0x5c4   : > { %v1002_v20 = vpop.permute.xlu0 %1001 }
 0x5c5   : > { %v838_v16 = vmul.f32 1.442695, %v836_v14 }
 0x5c6   : > { %v1004_v18 = vpop.permute.xlu1 %1003 }
 0x5c7   : > { %2910 = vpow2.f32 %v838_v16 }
 0x5c8   : > { %2912 = vpow2.f32 %v840_v15  ;;  %v1109_v22 = vpop.permute.xlu0 %1108 }
 0x5ca   : > { %v1107_v21 = vpop.permute.xlu1 %1106 }
 0x5cc   : > { %v994_v43 = vpop.permute.xlu0 %993 }
 0x5cd   : > { %v998_v54 = vmul.f32 %v994_v43, %v3383_v1 }
 0x5ce   : > { %v1099_v41 = vpop.permute.xlu1 %1098 }
 0x5cf   : > { %v1103_v45 = vmul.f32 %v1099_v41, %v990_v10  ;;  %v2615_v10 = vld [vmem:[%s3748_s3 + $0x2] ss:$0 sm:$0xff] }
 0x5d2   : > { %v1097_v42 = vpop.permute.xlu1 %1096 }
 0x5d3   : > { %v1102_v49 = vmul.f32 %v1097_v42, %v989_v8  ;;  %v2616_v8 = vld [vmem:[%s3749_s4 + $0x2] ss:$0 sm:$0xff] }
 0x5d4   : > { %v3400_v17 = vpop.eup %2910 }
 0x5d5   : > { %v3402_v19 = vpop.eup %2912  ;;  %2747 = vmatprep.mubr.msk.f32.mxu1 %vm494_vm1, %v3400_v17 }
 0x5d6   : > { %2748 = vmatmul.mubr.msk.f32.vlgmr.msra.gmra.mxu1 %vm494_vm1, %v3402_v19  ;;  %v992_v44 = vpop.permute.xlu1 %991 }
 0x5d7   : > { %2751 = vmatpush3.msra.mxu1 %v3284_v39  ;;  %2754 = vmatprep.mubr.msk.f32.mxu1 %vm494_vm1, %v1002_v20  ;;  %v997_v50 = vmul.f32 %v992_v44, %v960_v5 }
 0x5d8   : > { %2752 = vmatprep.subr.mxu1 %v3289_v40 }
 0x5d9   : > { %2753 = vmatpush3.msra.mxu1 %v3289_v40 }
 0x5da   : > { %2757 = vmatprep.subr.mxu1 %v3284_v39  ;;  %2755 = vmatmul.mubr.msk.f32.vlgmr.msra.gmra.mxu1 %vm494_vm1, %v1004_v18 }
 0x5db   : > { %2758 = vmatpush3.msra.mxu1 %v3284_v39  ;;  %2761 = vmatprep.mubr.msk.f32.mxu1 %vm494_vm1, %v1107_v21 }
 0x5dc   : > { %2759 = vmatprep.subr.mxu1 %v3289_v40 }
 0x5dd   : > { %2760 = vmatpush3.msra.mxu1 %v3289_v40 }
 0x5de   : > { %2762 = vmatmul.mubr.msk.f32.vlgmr.msra.gmra.mxu1 %vm494_vm1, %v1109_v22 }
 0x696   : > { %v3419_v23 = vpop.f32.mrf.mxu1 }
 0x698   : > { %v3421_v24 = vpop.f32.mrf.mxu1 }
 0x69a   : > { %v2756_v25 = vpop.f32.mrf.mxu1 }
 0x69b   : > { %v1085_v38 = vmul.f32 %v2756_v25, %v3335_v9 }
 0x69c   : > { %v1075_v32 = vpop.f32.mrf.mxu1 }
 0x69d   : > { %v1084_v33 = vmul.f32 %v1075_v32, %v3327_v4 }
 0x69e   : > { %v2763_v34 = vpop.f32.mrf.mxu1 }
 0x69f   : > { %v1190_v35 = vmul.f32 %v2763_v34, %v3335_v9  ;;  %1088 = vrot.lane.b32.xlu1 %v1084_v33, %s3025_s13 }
 0x6a0   : > { %v1180_v36 = vpop.f32.mrf.mxu1 }
 0x6a1   : > { %1195 = vrot.lane.b32.xlu0 %v1190_v35, %s3024_s26  ;;  %v1189_v37 = vmul.f32 %v1180_v36, %v3327_v4 }
 0x6a5   : > { %1193 = vrot.lane.b32.xlu0 %v1189_v37, %s3024_s26 }
 0x6a9   : > { %1090 = vrot.lane.b32.xlu0 %v1085_v38, %s3025_s13 }
 0x711   : > { %v1089_v48 = vpop.permute.xlu1 %1088 }
 0x712   : > { %v1094_v52 = vadd.f32 %v1089_v48, %v997_v50 }
 0x713   : > { %v1196_v46 = vpop.permute.xlu0 %1195 }
 0x714   : > { %v1200_v47 = vadd.f32 %v1196_v46, %v1103_v45 }
 0x716   : > { %1211 = vrot.lane.b32.xlu1 %v1200_v47, %s3022_s23 }
 0x717   : > { %v1194_v51 = vpop.permute.xlu0 %1193 }
 0x718   : > { %v1199_v53 = vadd.f32 %v1194_v51, %v1102_v49 }
 0x71a   : > { %1209 = vrot.lane.b32.xlu0 %v1199_v53, %s3022_s23  ;;  %1203 = vrot.lane.b32.xlu1 %v1094_v52, %s3023_s24 }
 0x71b   : > { %v1091_v55 = vpop.permute.xlu0 %1090 }
 0x71c   : > { %v1095_v56 = vadd.f32 %v1091_v55, %v998_v54 }
 0x71e   : > { %1205 = vrot.lane.b32.xlu0 %v1095_v56, %s3023_s24  ;;  %1407 = vrot.lane.b32.xlu1 %v3257_v28, %s3026_s17 }
 0x722   : > { %1409 = vrot.lane.b32.xlu0 %v3267_v31, %s3026_s17  ;;  %1436 = vrot.lane.b32.xlu1 %v3257_v28, %s3027_s19 }
 0x726   : > { %1438 = vrot.lane.b32.xlu0 %v3267_v31, %s3027_s19 }
 0x788   : > { %v1212_v57 = vpop.permute.xlu1 %1211 }
 0x789   : > { %2764 = vmatprep.subr.msk.mxu1 %vm494_vm1, %v1212_v57 }
 0x78a   : > { %2765 = vmatpush3.xpose.msk.msra.mxu1 %vm494_vm1, %v1212_v57 }
 0x78c   : > { %v1210_v58 = vpop.permute.xlu0 %1209  ;;  %v1204_v59 = vpop.permute.xlu1 %1203 }
 0x78d   : > { %2766 = vmatprep.subr.msk.mxu1 %vm494_vm1, %v1210_v58  ;;  %2768 = vmatprep.mubr.msk.f32.mxu1 %vm494_vm1, %v1204_v59 }
 0x78e   : > { %2767 = vmatpush3.xpose.msk.msra.mxu1 %vm494_vm1, %v1210_v58 }
 0x790   : > { %v1206_v60 = vpop.permute.xlu0 %1205  ;;  %v1408_v61 = vpop.permute.xlu1 %1407 }
 0x791   : > { %2769 = vmatmul.mubr.msk.f32.vlgmr.msra.gmra.mxu1 %vm494_vm1, %v1206_v60  ;;  %v1413_v62 = vsel %vm494_vm1, %v1408_v61, 0.0 }
 0x792   : > { %1414 = vadd.xlane.f32.xlu1 %v1413_v62 }
 0x794   : > { %v1410_v0 = vpop.permute.xlu0 %1409  ;;  %v1437_v3 = vpop.permute.xlu1 %1436 }
 0x795   : > { %v1416_v1 = vsel %vm494_vm1, %v1410_v0, 0.0  ;;  %v1442_v7 = vsel %vm494_vm1, %v1437_v3, 0.0 }
 0x796   : > { %1417 = vadd.xlane.f32.xlu0 %v1416_v1 }
 0x798   : > { %v1439_v5 = vpop.permute.xlu0 %1438 }
 0x799   : > { %v1445_v6 = vsel %vm494_vm1, %v1439_v5, 0.0 }
 0x79a   : > { %1446 = vadd.xlane.f32.xlu1 %v1445_v6  ;;  %1443 = vadd.xlane.f32.xlu0 %v1442_v7 }
 0x7ab   : > { %1460 = vrot.lane.b32.xlu1 %v2616_v8, %s3026_s17 }
 0x7af   : > { %1310 = vrot.lane.b32.xlu1 %v3259_v29, %s3023_s24 }
 0x7b0   : > { %1431 = vrot.lane.b32.xlu0 %v2615_v10, %s3027_s19 }
 0x81b   : > { %v1415_v12 = vpop.xlane.xlu1 %1414 }
 0x81c   : > { %v1419_v13 = vmax.f32 %v1415_v12, 1e-24 }
 0x81e   : > { %2914 = vrsqrt.f32 %v1419_v13 }
 0x81f   : > { %v1418_v11 = vpop.xlane.xlu0 %1417 }
 0x820   : > { %v1420_v20 = vmax.f32 %v1418_v11, 1e-24 }
 0x823   : > { %v1444_v14 = vpop.xlane.xlu0 %1443  ;;  %v1447_v22 = vpop.xlane.xlu1 %1446 }
 0x824   : > { %v1448_v15 = vmax.f32 %v1444_v14, 1e-24  ;;  %v1449_v32 = vmax.f32 %v1447_v22, 1e-24 }
 0x826   : > { %2916 = vrsqrt.f32 %v1448_v15 }
 0x827   : > { %2918 = vrsqrt.f32 %v1420_v20  ;;  %v1432_v36 = vpop.permute.xlu0 %1431  ;;  %v1461_v42 = vpop.permute.xlu1 %1460 }
 0x828   : > { %2920 = vrsqrt.f32 %v1449_v32 }
 0x82b   : > { %v2915_v33 = vpop.eup %2914  ;;  %v1311_v49 = vpop.permute.xlu1 %1310 }
 0x82c   : > { %v1423_v34 = vmul.f32 %v2915_v33, %v3253_v27 }
 0x82e   : > { %v3468_v41 = vmul.f32 %v1432_v36, %v1423_v34 }
 0x833   : > { %v2917_v35 = vpop.eup %2916 }
 0x834   : > { %v2919_v37 = vpop.eup %2918  ;;  %v1452_v38 = vmul.f32 %v2917_v35, %v3253_v27 }
 0x835   : > { %v1424_v43 = vmul.f32 %v2919_v37, %v3263_v30  ;;  %v2921_v44 = vpop.eup %2920 }
 0x836   : > { %v3473_v45 = vmul.f32 %v1461_v42, %v1452_v38  ;;  %v1453_v46 = vmul.f32 %v2921_v44, %v3263_v30 }
 0x837   : > { %v3480_v47 = vmul.f32 %v1432_v36, %v1424_v43 }
 0x838   : > { %v1464_v48 = vmul.f32 %v1461_v42, %v1453_v46 }
 0x851   : > { %v2770_v16 = vpop.f32.mrf.mxu1 }
 0x852   : > { %v1299_v18 = vsel %vm494_vm1, %v2770_v16, -inf }
 0x853   : > { %v1287_v21 = vpop.f32.mrf.mxu1  ;;  %1300 = vmax.xlane.f32.xlu0 %v1299_v18 }
 0x854   : > { %v1296_v25 = vsel %vm494_vm1, %v1287_v21, -inf }
 0x855   : > { %1297 = vmax.xlane.f32.xlu1 %v1296_v25 }
 0x866   : > { %1475 = vrot.lane.b32.xlu1 %v3468_v41, %s3026_s17 }
 0x869   : > { %1312 = vrot.lane.b32.xlu0 %v3358_v26, %s3023_s24 }
 0x86a   : > { %1580 = vrot.lane.b32.xlu1 %v3473_v45, %s3027_s19 }
 0x86d   : > { %1477 = vrot.lane.b32.xlu0 %v3480_v47, %s3026_s17 }
 0x86e   : > { %1572 = vrot.lane.b32.xlu1 %v3308_v63, %s3026_s17 }
 0x871   : > { %1582 = vrot.lane.b32.xlu0 %v1464_v48, %s3027_s19 }
 0x872   : > { %1570 = vrot.lane.b32.xlu1 %v3322_v2, %s3026_s17 }
 0x875   : > { %1467 = vrot.lane.b32.xlu0 %v3308_v63, %s3027_s19 }
 0x876   : > { %1465 = vrot.lane.b32.xlu1 %v3322_v2, %s3027_s19 }
 0x8dc   : > { %v1301_v50 = vpop.xlane.xlu0 %1300 }
 0x8dd   : > { %v1303_v51 = vsub.f32 %v2770_v16, %v1301_v50 }
 0x8de   : > { %v1298_v52 = vpop.xlane.xlu1 %1297 }
 0x8df   : > { %v1302_v53 = vsub.f32 %v1287_v21, %v1298_v52  ;;  %v1306_v54 = vmul.f32 1.442695, %v1303_v51  ;;  %v2628_v51 = vld [vmem:[%s3749_s4 + $0x3] ss:$0 sm:$0xff] }
 0x8e0   : > { %v1313_v55 = vpop.permute.xlu0 %1312  ;;  %v2627_v52 = vld [vmem:[%s3748_s3 + $0x3] ss:$0 sm:$0xff] }
 0x8e1   : > { %v1304_v56 = vmul.f32 1.442695, %v1302_v53  ;;  %2771 = vmatprep.subr.mxu1 %v1313_v55 }
 0x8e2   : > { %2772 = vmatpush3.msra.mxu1 %v1313_v55  ;;  %v1476_v58 = vpop.permute.xlu1 %1475 }
 0x8e3   : > { %2922 = vpow2.f32 %v1304_v56  ;;  %2773 = vmatprep.subr.mxu1 %v1311_v49 }
 0x8e4   : > { %2924 = vpow2.f32 %v1306_v54  ;;  %2774 = vmatpush3.msra.mxu1 %v1311_v49  ;;  %v1478_v60 = vpop.permute.xlu0 %1477 }
 0x8e5   : > { %2778 = vmatprep.subr.mxu1 %v3284_v39 }
 0x8e6   : > { %v1581_v61 = vpop.permute.xlu1 %1580 }
 0x8e8   : > { %v1583_v62 = vpop.permute.xlu0 %1582 }
 0x8ea   : > { %v1573_v13 = vpop.permute.xlu1 %1572 }
 0x8eb   : > { %v1577_v18 = vmul.f32 %v1573_v13, %v1464_v48 }
 0x8ec   : > { %v1468_v15 = vpop.permute.xlu0 %1467 }
 0x8ed   : > { %v1472_v36 = vmul.f32 %v1468_v15, %v3480_v47 }
 0x8ee   : > { %v1571_v14 = vpop.permute.xlu1 %1570 }
 0x8ef   : > { %v1576_v25 = vmul.f32 %v1571_v14, %v3473_v45 }
 0x8f0   : > { %v3494_v57 = vpop.eup %2922 }
 0x8f1   : > { %v3496_v59 = vpop.eup %2924  ;;  %2775 = vmatprep.mubr.msk.f32.mxu1 %vm494_vm1, %v3494_v57 }
 0x8f2   : > { %2776 = vmatmul.mubr.msk.f32.vlgmr.msra.gmra.mxu1 %vm494_vm1, %v3496_v59  ;;  %v1466_v16 = vpop.permute.xlu1 %1465 }
 0x8f3   : > { %2779 = vmatpush3.msra.mxu1 %v3284_v39  ;;  %2782 = vmatprep.mubr.msk.f32.mxu1 %vm494_vm1, %v1476_v58  ;;  %v1471_v32 = vmul.f32 %v1466_v16, %v3468_v41 }
 0x8f4   : > { %2780 = vmatprep.subr.mxu1 %v3289_v40 }
 0x8f5   : > { %2781 = vmatpush3.msra.mxu1 %v3289_v40 }
 0x8f6   : > { %2785 = vmatprep.subr.mxu1 %v3284_v39  ;;  %2783 = vmatmul.mubr.msk.f32.vlgmr.msra.gmra.mxu1 %vm494_vm1, %v1478_v60 }
 0x8f7   : > { %2786 = vmatpush3.msra.mxu1 %v3284_v39  ;;  %2789 = vmatprep.mubr.msk.f32.mxu1 %vm494_vm1, %v1581_v61 }
 0x8f8   : > { %2787 = vmatprep.subr.mxu1 %v3289_v40 }
 0x8f9   : > { %2788 = vmatpush3.msra.mxu1 %v3289_v40 }
 0x8fa   : > { %2790 = vmatmul.mubr.msk.f32.vlgmr.msra.gmra.mxu1 %vm494_vm1, %v1583_v62 }
 0x9b2   : > { %v3513_v0 = vpop.f32.mrf.mxu1 }
 0x9b4   : > { %v3515_v1 = vpop.f32.mrf.mxu1 }
 0x9b6   : > { %v2784_v3 = vpop.f32.mrf.mxu1 }
 0x9b7   : > { %v1559_v12 = vmul.f32 %v2784_v3, %v3335_v9 }
 0x9b8   : > { %v1549_v5 = vpop.f32.mrf.mxu1 }
 0x9b9   : > { %v1558_v6 = vmul.f32 %v1549_v5, %v3327_v4 }
 0x9ba   : > { %v2791_v7 = vpop.f32.mrf.mxu1 }
 0x9bb   : > { %v1664_v8 = vmul.f32 %v2791_v7, %v3335_v9  ;;  %1562 = vrot.lane.b32.xlu1 %v1558_v6, %s3027_s19 }
 0x9bc   : > { %v1654_v10 = vpop.f32.mrf.mxu1 }
 0x9bd   : > { %1669 = vrot.lane.b32.xlu0 %v1664_v8, %s3026_s17  ;;  %v1663_v11 = vmul.f32 %v1654_v10, %v3327_v4 }
 0x9c1   : > { %1667 = vrot.lane.b32.xlu0 %v1663_v11, %s3026_s17 }
 0x9c5   : > { %1564 = vrot.lane.b32.xlu0 %v1559_v12, %s3027_s19 }
 0xa2d   : > { %v1563_v22 = vpop.permute.xlu1 %1562 }
 0xa2e   : > { %v1568_v34 = vadd.f32 %v1563_v22, %v1471_v32 }
 0xa2f   : > { %v1670_v20 = vpop.permute.xlu0 %1669 }
 0xa30   : > { %v1674_v21 = vadd.f32 %v1670_v20, %v1577_v18 }
 0xa32   : > { %1685 = vrot.lane.b32.xlu1 %v1674_v21, %s3027_s19 }
 0xa33   : > { %v1668_v33 = vpop.permute.xlu0 %1667 }
 0xa34   : > { %v1673_v35 = vadd.f32 %v1668_v33, %v1576_v25 }
 0xa36   : > { %1683 = vrot.lane.b32.xlu0 %v1673_v35, %s3027_s19  ;;  %1677 = vrot.lane.b32.xlu1 %v1568_v34, %s3026_s17 }
 0xa37   : > { %v1565_v37 = vpop.permute.xlu0 %1564 }
 0xa38   : > { %v1569_v38 = vadd.f32 %v1565_v37, %v1472_v36 }
 0xa3a   : > { %1679 = vrot.lane.b32.xlu0 %v1569_v38, %s3026_s17  ;;  %1879 = vrot.lane.b32.xlu1 %v3257_v28, %s3024_s26 }
 0xa3e   : > { %1881 = vrot.lane.b32.xlu0 %v3267_v31, %s3024_s26  ;;  %1908 = vrot.lane.b32.xlu1 %v3257_v28, %s3025_s13 }
 0xa42   : > { %1910 = vrot.lane.b32.xlu0 %v3267_v31, %s3025_s13 }
 0xaa4   : > { %v1686_v41 = vpop.permute.xlu1 %1685 }
 0xaa5   : > { %2792 = vmatprep.subr.msk.mxu1 %vm494_vm1, %v1686_v41 }
 0xaa6   : > { %2793 = vmatpush3.xpose.msk.msra.mxu1 %vm494_vm1, %v1686_v41 }
 0xaa8   : > { %v1684_v42 = vpop.permute.xlu0 %1683  ;;  %v1678_v43 = vpop.permute.xlu1 %1677 }
 0xaa9   : > { %2794 = vmatprep.subr.msk.mxu1 %vm494_vm1, %v1684_v42  ;;  %2796 = vmatprep.mubr.msk.f32.mxu1 %vm494_vm1, %v1678_v43 }
 0xaaa   : > { %2795 = vmatpush3.xpose.msk.msra.mxu1 %vm494_vm1, %v1684_v42 }
 0xaac   : > { %v1680_v44 = vpop.permute.xlu0 %1679  ;;  %v1880_v45 = vpop.permute.xlu1 %1879 }
 0xaad   : > { %2797 = vmatmul.mubr.msk.f32.vlgmr.msra.gmra.mxu1 %vm494_vm1, %v1680_v44  ;;  %v1885_v28 = vsel %vm494_vm1, %v1880_v45, 0.0 }
 0xaae   : > { %1886 = vadd.xlane.f32.xlu1 %v1885_v28 }
 0xab0   : > { %v1882_v31 = vpop.permute.xlu0 %1881  ;;  %v1909_v47 = vpop.permute.xlu1 %1908 }
 0xab1   : > { %v1888_v46 = vsel %vm494_vm1, %v1882_v31, 0.0  ;;  %v1914_v50 = vsel %vm494_vm1, %v1909_v47, 0.0 }
 0xab2   : > { %1889 = vadd.xlane.f32.xlu0 %v1888_v46 }
 0xab4   : > { %v1911_v48 = vpop.permute.xlu0 %1910 }
 0xab5   : > { %v1917_v49 = vsel %vm494_vm1, %v1911_v48, 0.0 }
 0xab6   : > { %1918 = vadd.xlane.f32.xlu1 %v1917_v49  ;;  %1915 = vadd.xlane.f32.xlu0 %v1914_v50 }
 0xac7   : > { %1932 = vrot.lane.b32.xlu1 %v2628_v51, %s3023_s24 }
 0xacb   : > { %1782 = vrot.lane.b32.xlu1 %v3259_v29, %s3026_s17 }
 0xacc   : > { %1903 = vrot.lane.b32.xlu0 %v2627_v52, %s3022_s23 }
 0xb37   : > { %v1887_v54 = vpop.xlane.xlu1 %1886 }
 0xb38   : > { %v1891_v55 = vmax.f32 %v1887_v54, 1e-24 }
 0xb3a   : > { %2926 = vrsqrt.f32 %v1891_v55 }
 0xb3b   : > { %v1890_v53 = vpop.xlane.xlu0 %1889 }
 0xb3c   : > { %v1892_v62 = vmax.f32 %v1890_v53, 1e-24 }
 0xb3f   : > { %v1916_v56 = vpop.xlane.xlu0 %1915  ;;  %v1919_v5 = vpop.xlane.xlu1 %1918 }
 0xb40   : > { %v1920_v58 = vmax.f32 %v1916_v56, 1e-24  ;;  %v1921_v7 = vmax.f32 %v1919_v5, 1e-24 }
 0xb42   : > { %2928 = vrsqrt.f32 %v1920_v58 }
 0xb43   : > { %2930 = vrsqrt.f32 %v1892_v62  ;;  %v1904_v12 = vpop.permute.xlu0 %1903  ;;  %v1933_v16 = vpop.permute.xlu1 %1932 }
 0xb44   : > { %2932 = vrsqrt.f32 %v1921_v7 }
 0xb47   : > { %v2927_v8 = vpop.eup %2926 }
 0xb48   : > { %v1895_v10 = vmul.f32 %v2927_v8, %v3253_v27 }
 0xb4a   : > { %v3564_v15 = vmul.f32 %v1904_v12, %v1895_v10 }
 0xb4f   : > { %v2929_v11 = vpop.eup %2928 }
 0xb50   : > { %v2931_v13 = vpop.eup %2930  ;;  %v1924_v14 = vmul.f32 %v2929_v11, %v3253_v27 }
 0xb51   : > { %v1896_v18 = vmul.f32 %v2931_v13, %v3263_v30  ;;  %v2933_v20 = vpop.eup %2932 }
 0xb52   : > { %v3569_v21 = vmul.f32 %v1933_v16, %v1924_v14  ;;  %v1925_v22 = vmul.f32 %v2933_v20, %v3263_v30  ;;  %v1783_v30 = vpop.permute.xlu1 %1782  ;;  %v1397_v20 = vsel %vm494_vm1, %v3494_v57, 0.0 }
 0xb53   : > { %v3576_v27 = vmul.f32 %v1904_v12, %v1896_v18  ;;  %v1400_v18 = vsel %vm494_vm1, %v3496_v59, 0.0 }
 0xb54   : > { %v1936_v25 = vmul.f32 %v1933_v16, %v1925_v22 }
 0xb6d   : > { %v2798_v60 = vpop.f32.mrf.mxu1 }
 0xb6e   : > { %v1773_v61 = vsel %vm494_vm1, %v2798_v60, -inf }
 0xb6f   : > { %v1761_v3 = vpop.f32.mrf.mxu1  ;;  %1774 = vmax.xlane.f32.xlu0 %v1773_v61 }
 0xb70   : > { %v1770_v6 = vsel %vm494_vm1, %v1761_v3, -inf }
 0xb71   : > { %1771 = vmax.xlane.f32.xlu1 %v1770_v6 }
 0xb82   : > { %1947 = vrot.lane.b32.xlu1 %v3564_v15, %s3024_s26 }
 0xb85   : > { %1784 = vrot.lane.b32.xlu0 %v3358_v26, %s3026_s17  ;;  %s3702_s17 = scalar_lea.hbm %s3753_s8, %s2651_s20 }
 0xb86   : > { %2052 = vrot.lane.b32.xlu1 %v3569_v21, %s3025_s13 }
 0xb89   : > { %1949 = vrot.lane.b32.xlu0 %v3576_v27, %s3024_s26 }
 0xb8a   : > { %2044 = vrot.lane.b32.xlu1 %v3308_v63, %s3023_s24 }
 0xb8d   : > { %2054 = vrot.lane.b32.xlu0 %v1936_v25, %s3025_s13 }
 0xb8e   : > { %2042 = vrot.lane.b32.xlu1 %v3322_v2, %s3023_s24 }
 0xb91   : > { %1939 = vrot.lane.b32.xlu0 %v3308_v63, %s3022_s23 }
 0xb92   : > { %1937 = vrot.lane.b32.xlu1 %v3322_v2, %s3022_s23 }
 0xbf8   : > { %v1775_v32 = vpop.xlane.xlu0 %1774 }
 0xbf9   : > { %v1777_v33 = vsub.f32 %v2798_v60, %v1775_v32 }
 0xbfa   : > { %v1772_v34 = vpop.xlane.xlu1 %1771 }
 0xbfb   : > { %v1776_v35 = vsub.f32 %v1761_v3, %v1772_v34  ;;  %v1780_v36 = vmul.f32 1.442695, %v1777_v33 }
 0xbfc   : > { %v1785_v37 = vpop.permute.xlu0 %1784 }
 0xbfd   : > { %v1778_v38 = vmul.f32 1.442695, %v1776_v35  ;;  %2799 = vmatprep.subr.mxu1 %v1785_v37 }
 0xbfe   : > { %2800 = vmatpush3.msra.mxu1 %v1785_v37  ;;  %v1948_v41 = vpop.permute.xlu1 %1947  ;;  %v926_v37 = vsel %vm494_vm1, %v3402_v19, 0.0 }
 0xbff   : > { %2934 = vpow2.f32 %v1778_v38  ;;  %2801 = vmatprep.subr.mxu1 %v1783_v30  ;;  %v923_v38 = vsel %vm494_vm1, %v3400_v17, 0.0 }
 0xc00   : > { %2936 = vpow2.f32 %v1780_v36  ;;  %2802 = vmatpush3.msra.mxu1 %v1783_v30  ;;  %v1950_v42 = vpop.permute.xlu0 %1949 }
 0xc01   : > { %2806 = vmatprep.subr.mxu1 %v3284_v39 }
 0xc02   : > { %v2053_v43 = vpop.permute.xlu1 %2052 }
 0xc04   : > { %v2055_v44 = vpop.permute.xlu0 %2054 }
 0xc06   : > { %v2045_v51 = vpop.permute.xlu1 %2044 }
 0xc07   : > { %v2049_v55 = vmul.f32 %v2045_v51, %v1936_v25 }
 0xc08   : > { %v1940_v53 = vpop.permute.xlu0 %1939 }
 0xc0a   : > { %v2043_v52 = vpop.permute.xlu1 %2042 }
 0xc0b   : > { %v2048_v61 = vmul.f32 %v2043_v52, %v3569_v21 }
 0xc0c   : > { %v3590_v63 = vpop.eup %2934 }
 0xc0d   : > { %v3592_v2 = vpop.eup %2936  ;;  %2803 = vmatprep.mubr.msk.f32.mxu1 %vm494_vm1, %v3590_v63  ;;  %v1869_v21 = vsel %vm494_vm1, %v3590_v63, 0.0 }
 0xc0e   : > { %2804 = vmatmul.mubr.msk.f32.vlgmr.msra.gmra.mxu1 %vm494_vm1, %v3592_v2  ;;  %v1938_v54 = vpop.permute.xlu1 %1937  ;;  %v1872_v22 = vsel %vm494_vm1, %v3592_v2, 0.0 }
 0xc0f   : > { %2807 = vmatpush3.msra.mxu1 %v3284_v39  ;;  %2810 = vmatprep.mubr.msk.f32.mxu1 %vm494_vm1, %v1948_v41  ;;  %v1943_v62 = vmul.f32 %v1938_v54, %v3564_v15 }
 0xc10   : > { %2808 = vmatprep.subr.mxu1 %v3289_v40 }
 0xc11   : > { %2809 = vmatpush3.msra.mxu1 %v3289_v40 }
 0xc12   : > { %2813 = vmatprep.subr.mxu1 %v3284_v39  ;;  %2811 = vmatmul.mubr.msk.f32.vlgmr.msra.gmra.mxu1 %vm494_vm1, %v1950_v42 }
 0xc13   : > { %2814 = vmatpush3.msra.mxu1 %v3284_v39  ;;  %2817 = vmatprep.mubr.msk.f32.mxu1 %vm494_vm1, %v2053_v43 }
 0xc14   : > { %2815 = vmatprep.subr.mxu1 %v3289_v40 }
 0xc15   : > { %2816 = vmatpush3.msra.mxu1 %v3289_v40 }
 0xc16   : > { %2818 = vmatmul.mubr.msk.f32.vlgmr.msra.gmra.mxu1 %vm494_vm1, %v2055_v44 }
 0xcce   : > { %v3609_v45 = vpop.f32.mrf.mxu1 }
 0xcd0   : > { %v3611_v28 = vpop.f32.mrf.mxu1 }
 0xcd2   : > { %v2812_v31 = vpop.f32.mrf.mxu1 }
 0xcd3   : > { %v2031_v50 = vmul.f32 %v2812_v31, %v3335_v9 }
 0xcd4   : > { %v2021_v46 = vpop.f32.mrf.mxu1 }
 0xcd5   : > { %v2030_v47 = vmul.f32 %v2021_v46, %v3327_v4 }
 0xcd6   : > { %v2819_v48 = vpop.f32.mrf.mxu1 }
 0xcd7   : > { %v2136_v39 = vmul.f32 %v2819_v48, %v3335_v9  ;;  %2034 = vrot.lane.b32.xlu1 %v2030_v47, %s3022_s23  ;;  %v1944_v9 = vmul.f32 %v1940_v53, %v3576_v27 }
 0xcd8   : > { %v2126_v49 = vpop.f32.mrf.mxu1 }
 0xcd9   : > { %2141 = vrot.lane.b32.xlu0 %v2136_v39, %s3023_s24  ;;  %v2135_v40 = vmul.f32 %v2126_v49, %v3327_v4  ;;  %v2382_v49 = vld [vmem:[%s3747_s2] sm:$0xff] }
 0xcdd   : > { %2139 = vrot.lane.b32.xlu0 %v2135_v40, %s3023_s24 }
 0xce1   : > { %2036 = vrot.lane.b32.xlu0 %v2031_v50, %s3022_s23 }
 0xd49   : > { %v2035_v60 = vpop.permute.xlu1 %2034 }
 0xd4a   : > { %v2040_v3 = vadd.f32 %v2035_v60, %v1943_v62 }
 0xd4b   : > { %v2142_v56 = vpop.permute.xlu0 %2141 }
 0xd4c   : > { %v2146_v58 = vadd.f32 %v2142_v56, %v2049_v55 }
 0xd4e   : > { %2157 = vrot.lane.b32.xlu1 %v2146_v58, %s3025_s13 }
 0xd4f   : > { %v2140_v4 = vpop.permute.xlu0 %2139 }
 0xd50   : > { %v2145_v5 = vadd.f32 %v2140_v4, %v2048_v61 }
 0xd52   : > { %2155 = vrot.lane.b32.xlu0 %v2145_v5, %s3025_s13  ;;  %2149 = vrot.lane.b32.xlu1 %v2040_v3, %s3024_s26 }
 0xd53   : > { %v2037_v6 = vpop.permute.xlu0 %2036 }
 0xd54   : > { %v2041_v7 = vadd.f32 %v2037_v6, %v1944_v9 }
 0xd56   : > { %2151 = vrot.lane.b32.xlu0 %v2041_v7, %s3024_s26 }
 0xdc0   : > { %v2158_v8 = vpop.permute.xlu1 %2157 }
 0xdc1   : > { %2820 = vmatprep.subr.msk.mxu1 %vm494_vm1, %v2158_v8 }
 0xdc2   : > { %2821 = vmatpush3.xpose.msk.msra.mxu1 %vm494_vm1, %v2158_v8 }
 0xdc4   : > { %v2156_v10 = vpop.permute.xlu0 %2155  ;;  %v2150_v11 = vpop.permute.xlu1 %2149 }
 0xdc5   : > { %2822 = vmatprep.subr.msk.mxu1 %vm494_vm1, %v2156_v10  ;;  %2824 = vmatprep.mubr.msk.f32.mxu1 %vm494_vm1, %v2150_v11 }
 0xdc6   : > { %2823 = vmatpush3.xpose.msk.msra.mxu1 %vm494_vm1, %v2156_v10 }
 0xdc8   : > { %v2152_v12 = vpop.permute.xlu0 %2151 }
 0xdc9   : > { %2825 = vmatmul.mubr.msk.f32.vlgmr.msra.gmra.mxu1 %vm494_vm1, %v2152_v12 }
 0xe89   : > { %v2826_v13 = vpop.f32.mrf.mxu1 }
 0xe8a   : > { %v2245_v14 = vsel %vm494_vm1, %v2826_v13, -inf }
 0xe8b   : > { %2246 = vmax.xlane.f32.xlu0 %v2245_v14  ;;  %v2233_v15 = vpop.f32.mrf.mxu1 }
 0xe8c   : > { %v2242_v16 = vsel %vm494_vm1, %v2233_v15, -inf }
 0xe8d   : > { %2243 = vmax.xlane.f32.xlu1 %v2242_v16 }
 0xe9e   : > { %2254 = vrot.lane.b32.xlu1 %v3259_v29, %s3024_s26 }
 0xea1   : > { %2256 = vrot.lane.b32.xlu0 %v3358_v26, %s3024_s26 }
 0xec0   : > { %1401 = vadd.xlane.f32.xlu0 %v1400_v18 }
 0xec2   : > { %1398 = vadd.xlane.f32.xlu1 %v1397_v20 }
 0xec4   : > { %1870 = vadd.xlane.f32.xlu0 %v1869_v21 }
 0xec6   : > { %1873 = vadd.xlane.f32.xlu1 %v1872_v22 }
 0xf14   : > { %v2247_v29 = vpop.xlane.xlu0 %2246 }
 0xf15   : > { %v2249_v27 = vsub.f32 %v2826_v13, %v2247_v29 }
 0xf16   : > { %v2244_v25 = vpop.xlane.xlu1 %2243 }
 0xf17   : > { %v2252_v26 = vmul.f32 1.442695, %v2249_v27  ;;  %v2248_v30 = vsub.f32 %v2233_v15, %v2244_v25 }
 0xf18   : > { %v2257_v32 = vpop.permute.xlu0 %2256 }
 0xf19   : > { %2938 = vpow2.f32 %v2252_v26  ;;  %v2250_v59 = vmul.f32 1.442695, %v2248_v30  ;;  %2827 = vmatprep.subr.mxu1 %v2257_v32 }
 0xf1a   : > { %2828 = vmatpush3.msra.mxu1 %v2257_v32  ;;  %v2255_v57 = vpop.permute.xlu1 %2254 }
 0xf1b   : > { %2940 = vpow2.f32 %v2250_v59  ;;  %2829 = vmatprep.subr.mxu1 %v2255_v57 }
 0xf1c   : > { %2830 = vmatpush3.msra.mxu1 %v2255_v57 }
 0xf26   : > { %v2939_v33 = vpop.eup %2938 }
 0xf27   : > { %v2344_v34 = vsel %vm494_vm1, %v2939_v33, 0.0 }
 0xf28   : > { %v2941_v35 = vpop.eup %2940  ;;  %2345 = vadd.xlane.f32.xlu1 %v2344_v34 }
 0xf29   : > { %2831 = vmatprep.mubr.msk.f32.mxu1 %vm494_vm1, %v2941_v35  ;;  %v2341_v36 = vsel %vm494_vm1, %v2941_v35, 0.0 }
 0xf2a   : > { %2342 = vadd.xlane.f32.xlu0 %v2341_v36  ;;  %2832 = vmatmul.mubr.msk.f32.vlgmr.msra.gmra.mxu1 %vm494_vm1, %v2939_v33 }
 0xf2c   : > { %927 = vadd.xlane.f32.xlu1 %v926_v37 }
 0xf2e   : > { %924 = vadd.xlane.f32.xlu0 %v923_v38 }
 0xf49   : > { %v1402_v63 = vpop.xlane.xlu0 %1401 }
 0xf4a   : > { %2942 = vrcp.f32 %v1402_v63 }
 0xf4b   : > { %v1399_v41 = vpop.xlane.xlu1 %1398 }
 0xf4c   : > { %2944 = vrcp.f32 %v1399_v41 }
 0xf4d   : > { %v1871_v2 = vpop.xlane.xlu0 %1870 }
 0xf4e   : > { %2946 = vrcp.f32 %v1871_v2 }
 0xf4f   : > { %v1874_v42 = vpop.xlane.xlu1 %1873 }
 0xf50   : > { %2948 = vrcp.f32 %v1874_v42 }
 0xf57   : > { %v2943_v43 = vpop.eup %2942 }
 0xf58   : > { %v1406_v44 = vmul.f32 %v2943_v43, %v3513_v0  ;;  %v2385_v0 = vld [vmem:[%s3747_s2 + $0x18] sm:$0xff] }
 0xf59   : > { %v2945_v31 = vpop.eup %2944  ;;  %2834 = vmatprep.subr.msk.mxu1 %vm2386_vm2, %v2385_v0 }
 0xf5a   : > { %2355 = vrot.lane.b32.xlu1 %v1406_v44, %s3025_s13  ;;  %v1405_v19 = vmul.f32 %v2945_v31, %v3515_v1  ;;  %v2384_v1 = vld [vmem:[%s3747_s2 + $0x10] sm:$0xff]  ;;  %2835 = vmatpush3.xpose.msk.msra.mxu1 %vm2386_vm2, %v2385_v0 }
 0xf5b   : > { %v2947_v46 = vpop.eup %2946  ;;  %2836 = vmatprep.subr.msk.mxu1 %vm2386_vm2, %v2384_v1 }
 0xf5c   : > { %2353 = vrot.lane.b32.xlu0 %v1405_v19, %s3025_s13  ;;  %v1877_v17 = vmul.f32 %v2947_v46, %v3611_v28 }
 0xf5d   : > { %v2949_v47 = vpop.eup %2948 }
 0xf5e   : > { %2361 = vrot.lane.b32.xlu1 %v1877_v17, %s3027_s19  ;;  %v1878_v48 = vmul.f32 %v2949_v47, %v3609_v45  ;;  %v2383_v45 = vld [vmem:[%s3747_s2 + $0x8] sm:$0xff]  ;;  %2837 = vmatpush3.xpose.msk.msra.mxu1 %vm2386_vm2, %v2384_v1 }
 0xf5f   : > { %2838 = vmatprep.subr.msk.mxu1 %vm2386_vm2, %v2383_v45 }
 0xf60   : > { %2363 = vrot.lane.b32.xlu0 %v1878_v48, %s3027_s19  ;;  %s2964_s19 = scalar_lea.vmem %s2963_s22, 512 }
 0xf62   : > { %2839 = vmatpush3.xpose.msk.msra.mxu1 %vm2386_vm2, %v2383_v45 }
 0xf63   : > { %2840 = vmatprep.subr.msk.mxu1 %vm2386_vm2, %v2382_v49 }
 0xf66   : > { %2841 = vmatpush3.xpose.msk.msra.mxu1 %vm2386_vm2, %v2382_v49 }
 0xfb1   : > { %v2346_v28 = vpop.xlane.xlu1 %2345 }
 0xfb2   : > { %2950 = vrcp.f32 %v2346_v28 }
 0xfb3   : > { %v2343_v39 = vpop.xlane.xlu0 %2342 }
 0xfb4   : > { %2952 = vrcp.f32 %v2343_v39 }
 0xfb5   : > { %v928_v56 = vpop.xlane.xlu1 %927 }
 0xfb7   : > { %v925_v55 = vpop.xlane.xlu0 %924 }
 0xfb8   : > { %2954 = vrcp.f32 %v925_v55 }
 0xfb9   : > { %2956 = vrcp.f32 %v928_v56 }
 0xfbf   : > { %v2951_v40 = vpop.eup %2950 }
 0xfc1   : > { %v2953_v52 = vpop.eup %2952 }
 0xfc5   : > { %v2955_v61 = vpop.eup %2954 }
 0xfc6   : > { %v2957_v62 = vpop.eup %2956  ;;  %v931_v4 = vmul.f32 %v2955_v61, %v3421_v24 }
 0xfc7   : > { %v932_v6 = vmul.f32 %v2957_v62, %v3419_v23 }
 0xfcc   : > { %v2356_v60 = vpop.permute.xlu1 %2355 }
 0xfcd   : > { %v2376_v8 = vsel %vm494_vm1, %v932_v6, %v2356_v60 }
 0xfce   : > { %v2354_v58 = vpop.permute.xlu0 %2353 }
 0xfcf   : > { %v2375_v9 = vsel %vm494_vm1, %v931_v4, %v2354_v58 }
 0xfd0   : > { %v2362_v5 = vpop.permute.xlu1 %2361 }
 0xfd1   : > { %v2377_v10 = vsel %vm330_vm0, %v2375_v9, %v2362_v5 }
 0xfd2   : > { %v2364_v3 = vpop.permute.xlu0 %2363 }
 0xfd3   : > { %v2378_v12 = vsel %vm330_vm0, %v2376_v8, %v2364_v3 }
 0xfea   : > { %v2833_v50 = vpop.f32.mrf.mxu1 }
 0xfeb   : > { %v2350_v51 = vmul.f32 %v2951_v40, %v2833_v50 }
 0xfec   : > { %v2332_v53 = vpop.f32.mrf.mxu1 }
 0xfed   : > { %v2349_v54 = vmul.f32 %v2953_v52, %v2332_v53  ;;  %2371 = vrot.lane.b32.xlu0 %v2350_v51, %s3022_s23 }
 0xfef   : > { %2369 = vrot.lane.b32.xlu1 %v2349_v54, %s3022_s23  ;;  %s296_s23 = sand.u32 1, %s3010_s28  }
 0xff0   : > { %s2562_s25 = sshll.u32 %s296_s23, 4  ;;  %s3705_s21 = scalar_lea.sflag [#allocation3], %s296_s23 }
 0xff1   : > { %s298_s10 = scalar_lea.vmem [#allocation2], %s2562_s25 }
 0xff2   : > { %s2496_s12 = sshll.u32 %s298_s10, 4  ;;  %s3696_s12 = int_to_ptr.vmem [resolvable:$true] %s2496_s12 }
 0xff3   : > { %s2958_s13 = scalar_lea.vmem %s3696_s12, 256  ;;  %p2965_p0 = scmp.lt.s32.totalorder %s3696_s12, %s2963_s22 }
 0xff4   : > { %p2959_p11 = scmp.ne.s32.totalorder %s3696_s12, %s2958_s13  ;;  %p2966_p1 = scmp.lt.s32.totalorder %s2964_s19, %s2958_s13 }
 0xff6   : > { %p2960_p12 = pnand %p2959_p11, %p3114_p5  ;;  %p2967_p2 = por %p2966_p1, %p2965_p0 }
 0xff8   : > { %p2961_p13 = pneg %p2960_p12 }
 0xffa   : > { %p2968_p3 = pnand %p2967_p2, %p2961_p13 }
0x105f   : > { %v2372_v7 = vpop.permute.xlu0 %2371 }
0x1060   : > { %v2381_v14 = vsel %vm2379_vm3, %v2378_v12, %v2372_v7 }
0x1061   : > { %v2370_v11 = vpop.permute.xlu1 %2369 }
0x1062   : > { %v2380_v13 = vsel %vm2379_vm3, %v2377_v10, %v2370_v11 }
0x1063   : > { %2842 = vmatprep.mubr.msk.f32.mxu1 %vm2386_vm2, %v2380_v13 }
0x1064   : > { %2843 = vmatmul.mubr.msk.f32.vlgmr.msra.gmra.mxu1 %vm2386_vm2, %v2381_v14 }
0x1124   : > { %v2844_v23 = vpop.f32.mrf.mxu1 }
0x1125   : > { %2481 = vst.msk [vmem:[%s298_s10 + $0x8] sm:$0xff] %vm330_vm0, %v2844_v23 }
0x1126   : > { %v2471_v24 = vpop.f32.mrf.mxu1 }
0x1127   : > { %2480 = vst.msk [vmem:[%s298_s10] sm:$0xff] %vm330_vm0, %v2471_v24 }
0x1128   : > { %2971 = shalt.err (!%p2968_p3)
}
0x1129   : > { %s2972_s18 = scalar_lea.hbm %s3702_s17, 256  ;;  %s2976_s10 = scalar_lea.hbm %s3753_s8, 512 }
0x112a   : > { %p2973_p4 = scmp.ne.s32.totalorder %s3702_s17, %s2972_s18  ;;  %p2977_p9 = scmp.lt.s32.totalorder %s3702_s17, %s3753_s8 }
0x112b   : > { %p2978_p10 = scmp.lt.s32.totalorder %s2976_s10, %s2972_s18 }
0x112c   : > { %p2974_p7 = pnand %p2973_p4, %p3114_p5 }
0x112d   : > { %p2979_p11 = por %p2978_p10, %p2977_p9 }
0x112e   : > { %p2975_p8 = pneg %p2974_p7 }
0x1130   : > { %p2980_p12 = pnand %p2979_p11, %p2975_p8 }
0x1132   : > { %2983 = shalt.err (!%p2980_p12)
}
0x1133   : > { %s3029_s26 = smov 128   ;;  %s3030_s13 = smov 8  }
0x1134   : > { %2845 = dma.vmem_to_hbm [thread:$0]  (%p3114_p5), %s3696_s12, 256, %s3702_s17, %s3705_s21, %s3029_s26, %s3029_s26, %s3030_s13  }
0x1135 PF: > { %p2851_p13 = scmp.ge.s32.totalorder %s3018_s30, 2  ;;  %s2511_s9 = sand.u32 1, %s3006_s27  }
0x1136   : > { %s2512_s22 = scalar_lea.sflag [#allocation3], %s2511_s9 }
0x1137   : > { %p2848_p0 = pnand %p2851_p13, %p3118_p6 }
0x1139   : > { %p2849_p1 = pneg %p2848_p0 }
0x113b   : > { %3001 = dma.done.wait (%p2849_p1), %s2512_s22, 256  }
0x113c   : > { %3003 = vsyncadd (%p2849_p1), %s2512_s22, 4294967040  ;;  %p18_p2 = scmp.ge.s32.totalorder %s3101_s11, 4   ;;  %s3756_s27 = smov %s3010_s28 }
0x113d   : > { %s3757_s28 = smov %s3014_s29  ;;  %s3758_s29 = smov %s3112_s14 }
0x113e   : > { %s3759_s30 = smov %s3101_s11  ;;  %20 = sbr.rel (!%p18_p2) target bundleno = 3 (0x3), region = 87 }
0x1143   :  { %2517 = vsyncpa [#allocation3], 1 }
0x1144   :  { %2519 = vsyncpa [#allocation3 + $0x1], 1 }

</bundles_post_ra>
